<compile_context>
chip_gen: v7x
topology: tpu7x:2x2x1
jax: 0.10.0
libtpu: 0.0.40
codegen_flags: <defaults>
</compile_context>

<pallas_src>
import jax
import jax.numpy as jnp
from jax.experimental import pallas as pl
from jax.experimental.pallas import tpu as pltpu

LANE = 128
SUBLANE = 8
NEG_BIG = -1e30  # padded-class bias: exp(NEG_BIG - max) underflows to exactly 0


def _round_up(n, m):
    return ((n + m - 1) // m) * m


def _pad2(a, rows, cols, fill=0.0):
    r, c = a.shape
    return jnp.pad(a, ((0, rows - r), (0, cols - c)), constant_values=fill)


def classifier_kernel(x_ref,
                      w1_ref, b1_ref,
                      w2_ref, b2_ref,
                      w3_ref, b3_ref,
                      w4_ref, b4_ref,
                      out_ref):
    # ---- fc1 ----  (Dropout == identity in eval mode)
    x = x_ref[...]                                                        # [TB, Hp] bf16

    h = jnp.dot(x, w1_ref[...], preferred_element_type=jnp.float32) + b1_ref[...]
    h = jnp.maximum(h, 0.0)                                               # ReLU (f32)

    h = jnp.dot(h.astype(w2_ref.dtype), w2_ref[...],
                preferred_element_type=jnp.float32) + b2_ref[...]
    h = jnp.maximum(h, 0.0)                                               # ReLU (f32)

    h = jnp.dot(h.astype(w3_ref.dtype), w3_ref[...],
                preferred_element_type=jnp.float32) + b3_ref[...]
    # (h here == self.mid_feat; not part of forward()'s return value)

    # ---- fc2 ----
    h = jnp.maximum(h, 0.0)                                               # ReLU (f32)
    logits = jnp.dot(h.astype(w4_ref.dtype), w4_ref[...],
                     preferred_element_type=jnp.float32) + b4_ref[...]
    # padded class lanes hold logit ~ -1e30 -> contribute exactly 0 to the lse

    # ---- log_softmax over last (lane-dense) dim ----
    m = jnp.max(logits, axis=-1, keepdims=True)
    z = logits - m
    lse = jnp.log(jnp.sum(jnp.exp(z), axis=-1, keepdims=True))
    out_ref[...] = (z - lse).astype(out_ref.dtype)


def _pick_batch_tile(B):
    """Batch tile: 256 rows for big batches, minimal-padding 1/2-tile split otherwise."""
    if B >= 512:
        return 256
    if B > 128:
        # two tiles (lets v7x use both TensorCores) with minimal padding
        return _round_up(pl.cdiv(B, 2), SUBLANE)
    return _round_up(B, SUBLANE)


def classifier_forward(x, params, *, tb=None):
    """x: [B, H] float32. params: dict of f32 weights/biases (see init_params)."""
    B, H = x.shape
    C = params["w4"].shape[1]

    # lane-dense padded widths
    Hp = _round_up(H, LANE)
    H2p = _round_up(max(H // 2, 1), LANE)
    H4p = _round_up(max(H // 4, 1), LANE)
    Cp = _round_up(C, LANE)

    # bf16 weights (zero-padded), f32 biases; padded class bias = -1e30
    w1 = _pad2(params["w1"], Hp, Hp).astype(jnp.bfloat16)
    w2 = _pad2(params["w2"], Hp, H2p).astype(jnp.bfloat16)
    w3 = _pad2(params["w3"], H2p, H4p).astype(jnp.bfloat16)
    w4 = _pad2(params["w4"], H4p, Cp).astype(jnp.bfloat16)
    b1 = _pad2(params["b1"], 1, Hp).astype(jnp.float32)
    b2 = _pad2(params["b2"], 1, H2p).astype(jnp.float32)
    b3 = _pad2(params["b3"], 1, H4p).astype(jnp.float32)
    b4 = _pad2(params["b4"], 1, Cp, fill=NEG_BIG).astype(jnp.float32)

    if tb is None:
        tb = _pick_batch_tile(B)
    Bp = _round_up(B, tb)
    nb = Bp // tb
    xp = jnp.pad(x, ((0, Bp - B), (0, Hp - H))).astype(jnp.bfloat16)

    batch_spec = lambda cols: pl.BlockSpec((tb, cols), lambda i: (i, 0))
    const_spec = lambda arr: pl.BlockSpec(arr.shape, lambda i: (0, 0))

    flops = 2 * Bp * (Hp * Hp + Hp * H2p + H2p * H4p + H4p * Cp)
    bytes_accessed = (xp.size * 2 + Bp * Cp * 4
                      + (w1.size + w2.size + w3.size + w4.size) * 2
                      + (b1.size + b2.size + b3.size + b4.size) * 4)

    out = pl.pallas_call(
        classifier_kernel,
        out_shape=jax.ShapeDtypeStruct((Bp, Cp), jnp.float32),
        grid_spec=pltpu.PrefetchScalarGridSpec(
            num_scalar_prefetch=0,
            grid=(nb,),
            in_specs=[
                batch_spec(Hp),
                const_spec(w1), const_spec(b1),
                const_spec(w2), const_spec(b2),
                const_spec(w3), const_spec(b3),
                const_spec(w4), const_spec(b4),
            ],
            out_specs=batch_spec(Cp),
        ),
        compiler_params=pltpu.CompilerParams(
            dimension_semantics=("parallel",),
            vmem_limit_bytes=64 * 1024 * 1024,
        ),
        cost_estimate=pl.CostEstimate(
            flops=flops,
            transcendentals=Bp * (Cp + 1),
            bytes_accessed=bytes_accessed,
        ),
    )(xp, w1, b1, w2, b2, w3, b3, w4, b4)

    return out[:B, :C]


def _linear_init(key, fan_in, fan_out):
    """PyTorch nn.Linear default init; weight returned pre-transposed [fan_in, fan_out]."""
    kw, kb = jax.random.split(key)
    bound = 1.0 / jnp.sqrt(jnp.float32(fan_in))
    w = jax.random.uniform(kw, (fan_in, fan_out), jnp.float32, -bound, bound)
    b = jax.random.uniform(kb, (1, fan_out), jnp.float32, -bound, bound)
    return w, b


def init_params(key, n_hidden, n_classes):
    h2, h4 = n_hidden // 2, n_hidden // 4
    k1, k2, k3, k4 = jax.random.split(key, 4)
    w1, b1 = _linear_init(k1, n_hidden, n_hidden)
    w2, b2 = _linear_init(k2, n_hidden, h2)
    w3, b3 = _linear_init(k3, h2, h4)
    w4, b4 = _linear_init(k4, h4, n_classes)
    return dict(w1=w1, b1=b1, w2=w2, b2=b2, w3=w3, b3=b3, w4=w4, b4=b4)


def _reference(x, p):
    """Plain-JAX reference with the same bf16-matmul / f32-accumulate numerics."""
    bf = jnp.bfloat16
    h = jnp.dot(x.astype(bf), p["w1"].astype(bf),
                preferred_element_type=jnp.float32) + p["b1"]
    h = jnp.maximum(h, 0.0)
    h = jnp.dot(h.astype(bf), p["w2"].astype(bf),
                preferred_element_type=jnp.float32) + p["b2"]
    h = jnp.maximum(h, 0.0)
    h = jnp.dot(h.astype(bf), p["w3"].astype(bf),
                preferred_element_type=jnp.float32) + p["b3"]
    h = jnp.maximum(h, 0.0)
    logits = jnp.dot(h.astype(bf), p["w4"].astype(bf),
                     preferred_element_type=jnp.float32) + p["b4"]
    m = jnp.max(logits, axis=-1, keepdims=True)
    z = logits - m
    return z - jnp.log(jnp.sum(jnp.exp(z), axis=-1, keepdims=True))


if __name__ == "__main__":
    B = 300        # batch (node features) -> split into 2 batch tiles of 152 rows
    H = 128        # n_hidden  -> H/2 = 64, H/4 = 32 (all lane-padded to 128)
    C = 10         # n_classes (lane-padded to 128, sliced back)

    key = jax.random.PRNGKey(0)
    kx, kp = jax.random.split(key)
    x = jax.random.normal(kx, (B, H), dtype=jnp.float32)
    params = init_params(kp, H, C)

    out = classifier_forward(x, params)
    out = jax.block_until_ready(out)

    ref = _reference(x, params)

    assert out.shape == (B, C)
    assert bool(jnp.all(jnp.isfinite(out)))
    assert jnp.allclose(out, ref, atol=1e-3, rtol=1e-3), \
        f"max abs diff {float(jnp.max(jnp.abs(out - ref)))}"
    print("KERNEL_OK")
</pallas_src>

<mosaic_0001>
module attributes {stable_mosaic.version = 11 : i64} {
  func.func @classifier_kernel(%arg0: i32, %arg1: memref<152x128xbf16, #tpu.memory_space<vmem>>, %arg2: memref<128x128xbf16, #tpu.memory_space<vmem>>, %arg3: memref<1x128xf32, #tpu.memory_space<vmem>>, %arg4: memref<128x128xbf16, #tpu.memory_space<vmem>>, %arg5: memref<1x128xf32, #tpu.memory_space<vmem>>, %arg6: memref<128x128xbf16, #tpu.memory_space<vmem>>, %arg7: memref<1x128xf32, #tpu.memory_space<vmem>>, %arg8: memref<128x128xbf16, #tpu.memory_space<vmem>>, %arg9: memref<1x128xf32, #tpu.memory_space<vmem>>, %arg10: memref<152x128xf32, #tpu.memory_space<vmem>>) attributes {dimension_semantics = [#tpu.dimension_semantics<parallel>], iteration_bounds = array<i64: 2>, scalar_prefetch = 0 : i64, scratch_operands = 0 : i64, tpu.core_type = #tpu.core_type<tc>, window_params = [{transform_indices = @transform_0, window_bounds = array<i64: 152, 128>}, {pipeline_mode = #tpu.pipeline_mode<synchronous>, transform_indices = @transform_1, window_bounds = array<i64: 128, 128>}, {pipeline_mode = #tpu.pipeline_mode<synchronous>, transform_indices = @transform_2, window_bounds = array<i64: 1, 128>}, {pipeline_mode = #tpu.pipeline_mode<synchronous>, transform_indices = @transform_3, window_bounds = array<i64: 128, 128>}, {pipeline_mode = #tpu.pipeline_mode<synchronous>, transform_indices = @transform_4, window_bounds = array<i64: 1, 128>}, {pipeline_mode = #tpu.pipeline_mode<synchronous>, transform_indices = @transform_5, window_bounds = array<i64: 128, 128>}, {pipeline_mode = #tpu.pipeline_mode<synchronous>, transform_indices = @transform_6, window_bounds = array<i64: 1, 128>}, {pipeline_mode = #tpu.pipeline_mode<synchronous>, transform_indices = @transform_7, window_bounds = array<i64: 128, 128>}, {pipeline_mode = #tpu.pipeline_mode<synchronous>, transform_indices = @transform_8, window_bounds = array<i64: 1, 128>}, {transform_indices = @transform_9, window_bounds = array<i64: 152, 128>}]} {
    %c0 = arith.constant 0 : index
    %c0_0 = arith.constant 0 : index
    %0 = vector.load %arg1[%c0, %c0_0] : memref<152x128xbf16, #tpu.memory_space<vmem>>, vector<152x128xbf16>
    %c0_1 = arith.constant 0 : index
    %c0_2 = arith.constant 0 : index
    %1 = vector.load %arg2[%c0_1, %c0_2] : memref<128x128xbf16, #tpu.memory_space<vmem>>, vector<128x128xbf16>
    %cst = arith.constant dense<0.000000e+00> : vector<152x128xf32>
    %2 = tpu.matmul %0, %1, %cst {dimension_numbers = #tpu.dot_dimension_numbers<[1], [0], [0], [1], [0, 0, 1, 1], [], []>} : vector<152x128xbf16>, vector<128x128xbf16>, vector<152x128xf32> -> vector<152x128xf32>
    %c0_3 = arith.constant 0 : index
    %c0_4 = arith.constant 0 : index
    %3 = vector.load %arg3[%c0_3, %c0_4] : memref<1x128xf32, #tpu.memory_space<vmem>>, vector<1x128xf32>
    %4 = vector.broadcast %3 : vector<1x128xf32> to vector<152x128xf32>
    %5 = arith.addf %2, %4 : vector<152x128xf32>
    %cst_5 = arith.constant 0.000000e+00 : f32
    %6 = vector.broadcast %cst_5 : f32 to vector<152x128xf32>
    %7 = arith.maximumf %5, %6 : vector<152x128xf32>
    %8 = arith.truncf %7 : vector<152x128xf32> to vector<152x128xbf16>
    %c0_6 = arith.constant 0 : index
    %c0_7 = arith.constant 0 : index
    %9 = vector.load %arg4[%c0_6, %c0_7] : memref<128x128xbf16, #tpu.memory_space<vmem>>, vector<128x128xbf16>
    %cst_8 = arith.constant dense<0.000000e+00> : vector<152x128xf32>
    %10 = tpu.matmul %8, %9, %cst_8 {dimension_numbers = #tpu.dot_dimension_numbers<[1], [0], [0], [1], [0, 0, 1, 1], [], []>} : vector<152x128xbf16>, vector<128x128xbf16>, vector<152x128xf32> -> vector<152x128xf32>
    %c0_9 = arith.constant 0 : index
    %c0_10 = arith.constant 0 : index
    %11 = vector.load %arg5[%c0_9, %c0_10] : memref<1x128xf32, #tpu.memory_space<vmem>>, vector<1x128xf32>
    %12 = vector.broadcast %11 : vector<1x128xf32> to vector<152x128xf32>
    %13 = arith.addf %10, %12 : vector<152x128xf32>
    %cst_11 = arith.constant 0.000000e+00 : f32
    %14 = vector.broadcast %cst_11 : f32 to vector<152x128xf32>
    %15 = arith.maximumf %13, %14 : vector<152x128xf32>
    %16 = arith.truncf %15 : vector<152x128xf32> to vector<152x128xbf16>
    %c0_12 = arith.constant 0 : index
    %c0_13 = arith.constant 0 : index
    %17 = vector.load %arg6[%c0_12, %c0_13] : memref<128x128xbf16, #tpu.memory_space<vmem>>, vector<128x128xbf16>
    %cst_14 = arith.constant dense<0.000000e+00> : vector<152x128xf32>
    %18 = tpu.matmul %16, %17, %cst_14 {dimension_numbers = #tpu.dot_dimension_numbers<[1], [0], [0], [1], [0, 0, 1, 1], [], []>} : vector<152x128xbf16>, vector<128x128xbf16>, vector<152x128xf32> -> vector<152x128xf32>
    %c0_15 = arith.constant 0 : index
    %c0_16 = arith.constant 0 : index
    %19 = vector.load %arg7[%c0_15, %c0_16] : memref<1x128xf32, #tpu.memory_space<vmem>>, vector<1x128xf32>
    %20 = vector.broadcast %19 : vector<1x128xf32> to vector<152x128xf32>
    %21 = arith.addf %18, %20 : vector<152x128xf32>
    %cst_17 = arith.constant 0.000000e+00 : f32
    %22 = vector.broadcast %cst_17 : f32 to vector<152x128xf32>
    %23 = arith.maximumf %21, %22 : vector<152x128xf32>
    %24 = arith.truncf %23 : vector<152x128xf32> to vector<152x128xbf16>
    %c0_18 = arith.constant 0 : index
    %c0_19 = arith.constant 0 : index
    %25 = vector.load %arg8[%c0_18, %c0_19] : memref<128x128xbf16, #tpu.memory_space<vmem>>, vector<128x128xbf16>
    %cst_20 = arith.constant dense<0.000000e+00> : vector<152x128xf32>
    %26 = tpu.matmul %24, %25, %cst_20 {dimension_numbers = #tpu.dot_dimension_numbers<[1], [0], [0], [1], [0, 0, 1, 1], [], []>} : vector<152x128xbf16>, vector<128x128xbf16>, vector<152x128xf32> -> vector<152x128xf32>
    %c0_21 = arith.constant 0 : index
    %c0_22 = arith.constant 0 : index
    %27 = vector.load %arg9[%c0_21, %c0_22] : memref<1x128xf32, #tpu.memory_space<vmem>>, vector<1x128xf32>
    %28 = vector.broadcast %27 : vector<1x128xf32> to vector<152x128xf32>
    %29 = arith.addf %26, %28 : vector<152x128xf32>
    %cst_23 = arith.constant dense<0xFF800000> : vector<152xf32>
    %30 = vector.multi_reduction <maximumf>, %29, %cst_23 [1] : vector<152x128xf32> to vector<152xf32>
    %31 = vector.shape_cast %30 : vector<152xf32> to vector<152x1xf32>
    %32 = vector.broadcast %31 : vector<152x1xf32> to vector<152x128xf32>
    %33 = arith.subf %29, %32 : vector<152x128xf32>
    %34 = math.exp %33 : vector<152x128xf32>
    %cst_24 = arith.constant dense<0.000000e+00> : vector<152xf32>
    %35 = vector.multi_reduction <add>, %34, %cst_24 [1] : vector<152x128xf32> to vector<152xf32>
    %36 = vector.shape_cast %35 : vector<152xf32> to vector<152x1xf32>
    %37 = math.log %36 : vector<152x1xf32>
    %38 = vector.broadcast %37 : vector<152x1xf32> to vector<152x128xf32>
    %39 = arith.subf %33, %38 : vector<152x128xf32>
    %c0_25 = arith.constant 0 : index
    %c0_26 = arith.constant 0 : index
    %40 = vector.load %arg10[%c0_25, %c0_26] : memref<152x128xf32, #tpu.memory_space<vmem>>, vector<152x128xf32>
    tpu.vector_store %arg10[%c0_25, %c0_26], %39 {strides = array<i32>} : memref<152x128xf32, #tpu.memory_space<vmem>>, vector<152x128xf32>,
    return
  }
  func.func @transform_0(%arg0: i32) -> (i32, i32) {
    %c0_i32 = arith.constant 0 : i32
    %c0_i32_0 = arith.constant 0 : i32
    return %arg0, %c0_i32 : i32, i32
  }
  func.func @transform_1(%arg0: i32) -> (i32, i32) {
    %c0_i32 = arith.constant 0 : i32
    %c0_i32_0 = arith.constant 0 : i32
    %c0_i32_1 = arith.constant 0 : i32
    return %c0_i32, %c0_i32_0 : i32, i32
  }
  func.func @transform_2(%arg0: i32) -> (i32, i32) {
    %c0_i32 = arith.constant 0 : i32
    %c0_i32_0 = arith.constant 0 : i32
    %c0_i32_1 = arith.constant 0 : i32
    return %c0_i32, %c0_i32_0 : i32, i32
  }
  func.func @transform_3(%arg0: i32) -> (i32, i32) {
    %c0_i32 = arith.constant 0 : i32
    %c0_i32_0 = arith.constant 0 : i32
    %c0_i32_1 = arith.constant 0 : i32
    return %c0_i32, %c0_i32_0 : i32, i32
  }
  func.func @transform_4(%arg0: i32) -> (i32, i32) {
    %c0_i32 = arith.constant 0 : i32
    %c0_i32_0 = arith.constant 0 : i32
    %c0_i32_1 = arith.constant 0 : i32
    return %c0_i32, %c0_i32_0 : i32, i32
  }
  func.func @transform_5(%arg0: i32) -> (i32, i32) {
    %c0_i32 = arith.constant 0 : i32
    %c0_i32_0 = arith.constant 0 : i32
    %c0_i32_1 = arith.constant 0 : i32
    return %c0_i32, %c0_i32_0 : i32, i32
  }
  func.func @transform_6(%arg0: i32) -> (i32, i32) {
    %c0_i32 = arith.constant 0 : i32
    %c0_i32_0 = arith.constant 0 : i32
    %c0_i32_1 = arith.constant 0 : i32
    return %c0_i32, %c0_i32_0 : i32, i32
  }
  func.func @transform_7(%arg0: i32) -> (i32, i32) {
    %c0_i32 = arith.constant 0 : i32
    %c0_i32_0 = arith.constant 0 : i32
    %c0_i32_1 = arith.constant 0 : i32
    return %c0_i32, %c0_i32_0 : i32, i32
  }
  func.func @transform_8(%arg0: i32) -> (i32, i32) {
    %c0_i32 = arith.constant 0 : i32
    %c0_i32_0 = arith.constant 0 : i32
    %c0_i32_1 = arith.constant 0 : i32
    return %c0_i32, %c0_i32_0 : i32, i32
  }
  func.func @transform_9(%arg0: i32) -> (i32, i32) {
    %c0_i32 = arith.constant 0 : i32
    %c0_i32_0 = arith.constant 0 : i32
    return %arg0, %c0_i32 : i32, i32
  }
}

</mosaic_0001>

<bundles_post_ra>
// kernel: tpu_custom_call.1
= control target key start
LH: loop header
LB: loop body
LE: loop exit
PB: predicated region body
PF: predicated region fallthrough
CT: control target
= control target key end

     0   :  { %s3268_s0 = inlined_call_operand.hbm [shape: bf16[304,128], index: 0, kind: input, shape index: {}]   ;;  %s3269_s1 = inlined_call_operand.hbm [shape: bf16[128,128], index: 1, kind: input, shape index: {}]   ;;  %s3270_s2 = inlined_call_operand.hbm [shape: f32[1,128], index: 2, kind: input, shape index: {}]   ;;  %s3271_s3 = inlined_call_operand.hbm [shape: bf16[128,128], index: 3, kind: input, shape index: {}]   ;;  %s3272_s4 = inlined_call_operand.hbm [shape: f32[1,128], index: 4, kind: input, shape index: {}]   ;;  %s3273_s5 = inlined_call_operand.hbm [shape: bf16[128,128], index: 5, kind: input, shape index: {}]   ;;  %s3274_s6 = inlined_call_operand.hbm [shape: f32[1,128], index: 6, kind: input, shape index: {}]   ;;  %s3275_s7 = inlined_call_operand.hbm [shape: bf16[128,128], index: 7, kind: input, shape index: {}]   ;;  %s3276_s8 = inlined_call_operand.hbm [shape: f32[1,128], index: 8, kind: input, shape index: {}]   ;;  %s3277_s9 = inlined_call_operand.hbm [shape: f32[304,128], index: 9, kind: output, shape index: {}]  }
   0x1   :  { %3284 = sst [smem:[#allocation24_spill]] %s3269_s1 }
   0x2   :  { %3285 = sst [smem:[#allocation25_spill]] %s3270_s2 }
   0x3   :  { %3286 = sst [smem:[#allocation26_spill]] %s3277_s9 }
   0x4   :  { %14 = vsyncpa [#allocation3], 0 }
   0x5   :  { %16 = vsyncpa [#allocation3 + $0x1], 0 }
   0x6   :  { %17 = vsyncpa [#allocation6], 0 }
   0x7   :  { %18 = vsyncpa [#allocation9], 0 }
   0x8   :  { %19 = vsyncpa [#allocation12], 0 }
   0x9   :  { %20 = vsyncpa [#allocation15], 0 }
   0xa   :  { %21 = vsyncpa [#allocation4], 0 }
   0xb   :  { %23 = vsyncpa [#allocation4 + $0x1], 0  ;;  %s2672_s30 = smov 0   ;;  %s2674_s10 = smov 0  }
   0xc   :  { %s2676_s11 = smov 0   ;;  %s2678_s12 = smov 0  }
   0xd LB: > { %s2608_s13 = smov [#allocation5]   ;;  %s2693_s15 = sadd.s32 4294967295, %s2606_s12   ;;  %s2606_s12 = sphi %s2678_s12, %s3315_s12   ;;  %s2602_s11 = sphi %s2676_s11, %s3314_s11   ;;  %s2598_s10 = sphi %s2674_s10, %s3313_s10   ;;  %s2594_s30 = sphi %s2672_s30, %s3312_s30  }
   0xe   : > { %s266_s14 = sshll.u32 %s2608_s13, 4  ;;  %p1731_p0 = scmp.ge.s32.totalorder %s2606_s12, 1  ;;  %s2698_s14 = int_to_ptr.vmem [resolvable:$true] %s266_s14 }
   0xf   : > { %p3279_p1 = scmp.eq.s32.totalorder %s2693_s15, 0  ;;  %p254_p2 = scmp.lt.s32.totalorder %s2606_s12, 3 }
  0x10   : > { %s2609_s17 = smov [#allocation8]   ;;  %s2610_s20 = smov [#allocation11]  }
  0x11   : > { %p2700_p3 = pnand %p1731_p0, %p254_p2  ;;  %s290_s18 = sshll.u32 %s2609_s17, 4  ;;  %s2713_s18 = int_to_ptr.vmem [resolvable:$true] %s290_s18 }
  0x12   : > { %s314_s21 = sshll.u32 %s2610_s20, 4  ;;  %s3289_s1 = sld [smem:[#allocation24_spill]]  ;;  %s2715_s21 = int_to_ptr.vmem [resolvable:$true] %s314_s21 }
  0x13   : > { %s3287_s16 = scalar_select %p2700_p3, 1, 0 }
  0x14   : > { %p2057_p5 = pneg %p2700_p3 }
  0x16   : > { %p2709_p6 = pnand %p2057_p5, %p3279_p1 }
  0x18   : > { %s2270_s24 = scalar_lea.hbm %s3289_s1, 1024  ;;  %p2725_p8 = pneg %p2709_p6 }
  0x19   : > { %p2271_p7 = scmp.ne.s32.totalorder %s3289_s1, %s2270_s24  ;;  %p2277_p11 = scmp.lt.u32.totalorder %s2270_s24, %s3289_s1 }
  0x1b   : > { %p2273_p9 = pnand %p2725_p8, %p2271_p7 }
  0x1d   : > { %p2274_p10 = pneg %p2273_p9 }
  0x1f   : > { %p2279_p12 = pnand %p2277_p11, %p2274_p10 }
  0x21   : > { %2282 = shalt.err (!%p2279_p12)
}
  0x22   : > { %s2283_s13 = scalar_lea.vmem %s2698_s14, 1024  ;;  %p2291_p5 = scmp.lt.s32.totalorder %s2698_s14, %s2698_s14 }
  0x23   : > { %p2284_p13 = scmp.ne.s32.totalorder %s2698_s14, %s2283_s13  ;;  %p2292_p4 = scmp.lt.s32.totalorder %s2283_s13, %s2283_s13 }
  0x25   : > { %p2286_p0 = pnand %p2284_p13, %p2725_p8  ;;  %p2293_p7 = por %p2292_p4, %p2291_p5 }
  0x27   : > { %p2287_p2 = pneg %p2286_p0 }
  0x29   : > { %p2294_p9 = pnand %p2293_p7, %p2287_p2 }
  0x2b   : > { %2297 = shalt.err (!%p2294_p9)
}
  0x2c   : > { %s3281_s17 = smov 64   ;;  %s3282_s20 = smov 4  }
  0x2d   : > { %2060 = dma.hbm_to_vmem [thread:$0]  (!%p2709_p6), %s3289_s1, 1024, %s2698_s14, [#allocation6], %s3281_s17, %s3281_s17, %s3282_s20  }
  0x2e   : > { %s2298_s26 = scalar_lea.hbm %s3271_s3, 1024 }
  0x2f   : > { %p2299_p4 = scmp.ne.s32.totalorder %s3271_s3, %s2298_s26  ;;  %p2305_p12 = scmp.lt.u32.totalorder %s2298_s26, %s3271_s3 }
  0x31   : > { %p2301_p10 = pnand %p2299_p4, %p2725_p8 }
  0x33   : > { %p2302_p11 = pneg %p2301_p10 }
  0x35   : > { %p2307_p13 = pnand %p2305_p12, %p2302_p11 }
  0x37   : > { %2310 = shalt.err (!%p2307_p13)
}
  0x38   : > { %s2311_s14 = scalar_lea.vmem %s2713_s18, 1024  ;;  %p2319_p7 = scmp.lt.s32.totalorder %s2713_s18, %s2713_s18 }
  0x39   : > { %p2312_p0 = scmp.ne.s32.totalorder %s2713_s18, %s2311_s14  ;;  %p2320_p9 = scmp.lt.s32.totalorder %s2311_s14, %s2311_s14 }
  0x3b   : > { %p2314_p2 = pnand %p2312_p0, %p2725_p8  ;;  %p2321_p4 = por %p2320_p9, %p2319_p7 }
  0x3d   : > { %p2315_p5 = pneg %p2314_p2 }
  0x3f   : > { %p2322_p10 = pnand %p2321_p4, %p2315_p5 }
  0x41   : > { %2325 = shalt.err (!%p2322_p10)
}
  0x42   : > { %2066 = dma.hbm_to_vmem [thread:$0]  (!%p2709_p6), %s3271_s3, 1024, %s2713_s18, [#allocation9], %s3281_s17, %s3281_s17, %s3282_s20  }
  0x43   : > { %s2326_s25 = scalar_lea.hbm %s3273_s5, 1024 }
  0x44   : > { %p2327_p11 = scmp.ne.s32.totalorder %s3273_s5, %s2326_s25  ;;  %p2333_p0 = scmp.lt.u32.totalorder %s2326_s25, %s3273_s5 }
  0x46   : > { %p2329_p12 = pnand %p2327_p11, %p2725_p8 }
  0x48   : > { %p2330_p13 = pneg %p2329_p12 }
  0x4a   : > { %p2335_p2 = pnand %p2333_p0, %p2330_p13 }
  0x4c   : > { %2338 = shalt.err (!%p2335_p2)
}
  0x4d   : > { %s2339_s18 = scalar_lea.vmem %s2715_s21, 1024  ;;  %p2347_p4 = scmp.lt.s32.totalorder %s2715_s21, %s2715_s21 }
  0x4e   : > { %p2340_p5 = scmp.ne.s32.totalorder %s2715_s21, %s2339_s18  ;;  %p2348_p10 = scmp.lt.s32.totalorder %s2339_s18, %s2339_s18 }
  0x50   : > { %p2342_p7 = pnand %p2340_p5, %p2725_p8  ;;  %p2349_p11 = por %p2348_p10, %p2347_p4 }
  0x52   : > { %p2343_p9 = pneg %p2342_p7 }
  0x54   : > { %p2350_p12 = pnand %p2349_p11, %p2343_p9 }
  0x56   : > { %2353 = shalt.err (!%p2350_p12)
}
  0x57   : > { %2072 = dma.hbm_to_vmem [thread:$0]  (!%p2709_p6), %s3273_s5, 1024, %s2715_s21, [#allocation12], %s3281_s17, %s3281_s17, %s3282_s20  }
  0x58   : > { %s2613_s22 = smov [#allocation14]   ;;  %s2614_s24 = smov [#allocation7]  }
  0x59   : > { %s338_s23 = sshll.u32 %s2613_s22, 4  ;;  %s280_s25 = sshll.u32 %s2614_s24, 4  ;;  %s339_s23 = int_to_ptr.vmem [resolvable:$true] %s338_s23  ;;  %s281_s25 = int_to_ptr.vmem [resolvable:$true] %s280_s25 }
  0x5a   : > { %s2354_s29 = scalar_lea.hbm %s3275_s7, 1024 }
  0x5b   : > { %p2355_p13 = scmp.ne.s32.totalorder %s3275_s7, %s2354_s29  ;;  %p2361_p5 = scmp.lt.u32.totalorder %s2354_s29, %s3275_s7 }
  0x5d   : > { %p2357_p0 = pnand %p2355_p13, %p2725_p8 }
  0x5f   : > { %p2358_p2 = pneg %p2357_p0 }
  0x61   : > { %p2363_p7 = pnand %p2361_p5, %p2358_p2 }
  0x63   : > { %2366 = shalt.err (!%p2363_p7)
}
  0x64   : > { %s2367_s21 = scalar_lea.vmem %s339_s23, 1024  ;;  %p2375_p11 = scmp.lt.s32.totalorder %s339_s23, %s339_s23 }
  0x65   : > { %p2368_p9 = scmp.ne.s32.totalorder %s339_s23, %s2367_s21  ;;  %p2376_p12 = scmp.lt.s32.totalorder %s2367_s21, %s2367_s21 }
  0x67   : > { %p2370_p4 = pnand %p2368_p9, %p2725_p8  ;;  %p2377_p1 = por %p2376_p12, %p2375_p11 }
  0x69   : > { %p2371_p10 = pneg %p2370_p4 }
  0x6b   : > { %p2378_p3 = pnand %p2377_p1, %p2371_p10 }
  0x6d   : > { %2381 = shalt.err (!%p2378_p3)
}
  0x6e   : > { %2078 = dma.hbm_to_vmem [thread:$0]  (!%p2709_p6), %s3275_s7, 1024, %s339_s23, [#allocation15], %s3281_s17, %s3281_s17, %s3282_s20  }
  0x6f   : > { %s3291_s2 = sld [smem:[#allocation25_spill]] }
  0x75   : > { %s2382_s26 = scalar_lea.hbm %s3291_s2, 16 }
  0x76   : > { %p2383_p1 = scmp.ne.s32.totalorder %s3291_s2, %s2382_s26  ;;  %p2389_p0 = scmp.lt.u32.totalorder %s2382_s26, %s3291_s2 }
  0x78   : > { %p2385_p3 = pnand %p2383_p1, %p2725_p8 }
  0x7a   : > { %p2386_p13 = pneg %p2385_p3 }
  0x7c   : > { %p2391_p2 = pnand %p2389_p0, %p2386_p13 }
  0x7e   : > { %2394 = shalt.err (!%p2391_p2)
}
  0x7f   : > { %s2395_s14 = scalar_lea.vmem %s281_s25, 16  ;;  %s2402_s23 = scalar_lea.vmem %s281_s25, 32 }
  0x80   : > { %p2396_p5 = scmp.ne.s32.totalorder %s281_s25, %s2395_s14  ;;  %p2403_p4 = scmp.lt.s32.totalorder %s281_s25, %s281_s25 }
  0x81   : > { %p2404_p10 = scmp.lt.s32.totalorder %s2402_s23, %s2395_s14 }
  0x82   : > { %p2398_p7 = pnand %p2396_p5, %p2725_p8 }
  0x83   : > { %p2405_p11 = por %p2404_p10, %p2403_p4 }
  0x84   : > { %p2399_p9 = pneg %p2398_p7 }
  0x86   : > { %p2406_p12 = pnand %p2405_p11, %p2399_p9 }
  0x88   : > { %2409 = shalt.err (!%p2406_p12)
}
  0x89   : > { %2063 = dma.hbm_to_vmem [thread:$0]  (!%p2709_p6), %s3291_s2, 16, %s281_s25, [#allocation6]  }
  0x8a   : > { %s2615_s9 = smov [#allocation10]   ;;  %s2616_s24 = smov [#allocation13]  }
  0x8b   : > { %s304_s22 = sshll.u32 %s2615_s9, 4  ;;  %s328_s26 = sshll.u32 %s2616_s24, 4  ;;  %s305_s22 = int_to_ptr.vmem [resolvable:$true] %s304_s22  ;;  %s329_s26 = int_to_ptr.vmem [resolvable:$true] %s328_s26 }
  0x8c   : > { %s2410_s13 = scalar_lea.hbm %s3272_s4, 16 }
  0x8d   : > { %p2411_p1 = scmp.ne.s32.totalorder %s3272_s4, %s2410_s13  ;;  %p2417_p0 = scmp.lt.u32.totalorder %s2410_s13, %s3272_s4 }
  0x8f   : > { %p2413_p3 = pnand %p2411_p1, %p2725_p8 }
  0x91   : > { %p2414_p13 = pneg %p2413_p3 }
  0x93   : > { %p2419_p2 = pnand %p2417_p0, %p2414_p13 }
  0x95   : > { %2422 = shalt.err (!%p2419_p2)
}
  0x96   : > { %s2423_s25 = scalar_lea.vmem %s305_s22, 16  ;;  %s2430_s1 = scalar_lea.vmem %s305_s22, 32 }
  0x97   : > { %p2424_p5 = scmp.ne.s32.totalorder %s305_s22, %s2423_s25  ;;  %p2431_p4 = scmp.lt.s32.totalorder %s305_s22, %s305_s22 }
  0x98   : > { %p2432_p10 = scmp.lt.s32.totalorder %s2430_s1, %s2423_s25 }
  0x99   : > { %p2426_p7 = pnand %p2424_p5, %p2725_p8 }
  0x9a   : > { %p2433_p11 = por %p2432_p10, %p2431_p4 }
  0x9b   : > { %p2427_p9 = pneg %p2426_p7 }
  0x9d   : > { %p2434_p12 = pnand %p2433_p11, %p2427_p9 }
  0x9f   : > { %2437 = shalt.err (!%p2434_p12)
}
  0xa0   : > { %2069 = dma.hbm_to_vmem [thread:$0]  (!%p2709_p6), %s3272_s4, 16, %s305_s22, [#allocation9]  }
  0xa1   : > { %s2438_s13 = scalar_lea.hbm %s3274_s6, 16 }
  0xa2   : > { %p2439_p1 = scmp.ne.s32.totalorder %s3274_s6, %s2438_s13  ;;  %p2445_p0 = scmp.lt.u32.totalorder %s2438_s13, %s3274_s6 }
  0xa4   : > { %p2441_p3 = pnand %p2439_p1, %p2725_p8 }
  0xa6   : > { %p2442_p13 = pneg %p2441_p3 }
  0xa8   : > { %p2447_p2 = pnand %p2445_p0, %p2442_p13 }
  0xaa   : > { %2450 = shalt.err (!%p2447_p2)
}
  0xab   : > { %s2451_s25 = scalar_lea.vmem %s329_s26, 16  ;;  %s2458_s22 = scalar_lea.vmem %s329_s26, 32 }
  0xac   : > { %p2452_p5 = scmp.ne.s32.totalorder %s329_s26, %s2451_s25  ;;  %p2459_p4 = scmp.lt.s32.totalorder %s329_s26, %s329_s26 }
  0xad   : > { %p2460_p10 = scmp.lt.s32.totalorder %s2458_s22, %s2451_s25 }
  0xae   : > { %p2454_p7 = pnand %p2452_p5, %p2725_p8 }
  0xaf   : > { %p2461_p11 = por %p2460_p10, %p2459_p4 }
  0xb0   : > { %p2455_p9 = pneg %p2454_p7 }
  0xb2   : > { %p2462_p12 = pnand %p2461_p11, %p2455_p9 }
  0xb4   : > { %2465 = shalt.err (!%p2462_p12)
}
  0xb5   : > { %2075 = dma.hbm_to_vmem [thread:$0]  (!%p2709_p6), %s3274_s6, 16, %s329_s26, [#allocation12]  }
  0xb6   : > { %s2617_s24 = smov [#allocation16]   ;;  %s2466_s18 = scalar_lea.hbm %s3276_s8, 16 }
  0xb7   : > { %s352_s28 = sshll.u32 %s2617_s24, 4  ;;  %p2467_p1 = scmp.ne.s32.totalorder %s3276_s8, %s2466_s18  ;;  %s353_s28 = int_to_ptr.vmem [resolvable:$true] %s352_s28 }
  0xb8   : > { %p2473_p0 = scmp.lt.u32.totalorder %s2466_s18, %s3276_s8 }
  0xb9   : > { %p2469_p3 = pnand %p2467_p1, %p2725_p8 }
  0xbb   : > { %p2470_p13 = pneg %p2469_p3 }
  0xbd   : > { %p2475_p2 = pnand %p2473_p0, %p2470_p13 }
  0xbf   : > { %2478 = shalt.err (!%p2475_p2)
}
  0xc0   : > { %s2479_s26 = scalar_lea.vmem %s353_s28, 16  ;;  %s2486_s22 = scalar_lea.vmem %s353_s28, 32 }
  0xc1   : > { %p2480_p5 = scmp.ne.s32.totalorder %s353_s28, %s2479_s26  ;;  %p2487_p4 = scmp.lt.s32.totalorder %s353_s28, %s353_s28 }
  0xc2   : > { %p2488_p10 = scmp.lt.s32.totalorder %s2486_s22, %s2479_s26 }
  0xc3   : > { %p2482_p7 = pnand %p2480_p5, %p2725_p8 }
  0xc4   : > { %p2489_p11 = por %p2488_p10, %p2487_p4 }
  0xc5   : > { %p2483_p9 = pneg %p2482_p7 }
  0xc7   : > { %p2490_p12 = pnand %p2489_p11, %p2483_p9 }
  0xc9   : > { %2493 = shalt.err (!%p2490_p12)
}
  0xca   : > { %2081 = dma.hbm_to_vmem [thread:$0]  (!%p2709_p6), %s3276_s8, 16, %s353_s28, [#allocation15]  }
  0xcb   : > { %s1730_s27 = sadd.s32 4294967294, %s2606_s12   ;;  %s2896_s19 = sadd.s32 1, %s2606_s12  }
  0xcc   : > { %s33_s24 = ssub.s32 %s2606_s12, %s2896_s19  ;;  %s36_s29 = sadd.s32 1, %s2602_s11 }
  0xcd   : > { %p34_p8 = scmp.eq.s32.totalorder %s33_s24, 0  ;;  %p43_p1 = scmp.ne.s32.totalorder %s2602_s11, %s2598_s10 }
  0xce   : > { %p44_p3 = scmp.eq.s32.totalorder %s2606_s12, 0  ;;  %p49_p13 = scmp.ne.s32.totalorder %s2598_s10, %s2594_s30 }
  0xcf   : > { %s2907_s13 = scalar_select %p34_p8, %s2602_s11, %s36_s29  }
  0xd0   : > { %p45_p0 = por %p44_p3, %p43_p1  ;;  %p3292_p2 = scmp.eq.s32.totalorder %s2693_s15, 0 }
  0xd1   : > { %p241_p6 = scmp.eq.s32.totalorder %s2693_s15, 1  ;;  %p247_p7 = scmp.eq.s32.totalorder %s1730_s27, 1 }
  0xd2   : > { %p2911_p5 = por %p3292_p2, %p49_p13  ;;  %p2098_p9 = scmp.lt.s32.totalorder %s2606_s12, 2 }
  0xd3   : > { %s363_s28 = sand.u32 1, %s2602_s11   ;;  %p2918_p4 = por %p241_p6, %p43_p1 }
  0xd4   : > { %p2922_p10 = por %p247_p7, %p49_p13  ;;  %s2018_s21 = smul.u32 76, %s363_s28 }
  0xd5   : > { %s3294_s14 = scalar_select %p2918_p4, 1, 0 }
  0xd6   : > { %s3295_s23 = scalar_select %p2922_p10, 1, 0 }
  0xd7   : > { %s1800_s25 = smul.u32 1216, %s2606_s12  ;;  %p2927_p11 = pnand %p2098_p9, %p45_p0 }
  0xd8   : > { %s367_s27 = scalar_lea.vmem [#allocation2], %s2018_s21  ;;  %s2938_s29 = scalar_lea.sflag [#allocation3], %s363_s28 }
  0xd9   : > { %s2934_s9 = scalar_lea.hbm %s3268_s0, %s1800_s25  ;;  %s374_s24 = sshll.u32 %s367_s27, 4  ;;  %s2936_s24 = int_to_ptr.vmem [resolvable:$true] %s374_s24 }
  0xda   : > { %s2494_s17 = scalar_lea.hbm %s2934_s9, 1216  ;;  %p2496_p8 = pneg %p2927_p11 }
  0xdb   : > { %p2495_p12 = scmp.ne.s32.totalorder %s2934_s9, %s2494_s17  ;;  %s2499_s1 = scalar_lea.hbm %s3268_s0, 2432 }
  0xdc   : > { %p2500_p13 = scmp.lt.u32.totalorder %s2934_s9, %s3268_s0  ;;  %p2501_p0 = scmp.lt.u32.totalorder %s2499_s1, %s2494_s17 }
  0xdd   : > { %p2497_p1 = pnand %p2496_p8, %p2495_p12  ;;  %p2503_p6 = scmp.lt.u32.totalorder %s2494_s17, %s2934_s9 }
  0xde   : > { %p2502_p2 = por %p2501_p0, %p2500_p13 }
  0xdf   : > { %p2498_p3 = pneg %p2497_p1 }
  0xe0   : > { %p2504_p7 = por %p2503_p6, %p2502_p2 }
  0xe2   : > { %p2505_p9 = pnand %p2504_p7, %p2498_p3 }
  0xe4   : > { %2508 = shalt.err (!%p2505_p9)
}
  0xe5   : > { %s2509_s28 = scalar_lea.vmem %s2936_s24, 1216  ;;  %s2618_s21 = smov [#allocation2]  }
  0xe6   : > { %p2510_p12 = scmp.ne.s32.totalorder %s2936_s24, %s2509_s28  ;;  %s2514_s27 = sshll.u32 %s2618_s21, 4  ;;  %s2515_s27 = int_to_ptr.vmem [resolvable:$false] %s2514_s27 }
  0xe7   : > { %s2516_s2 = scalar_lea.vmem %s2515_s27, 2432  ;;  %p2517_p4 = scmp.lt.s32.totalorder %s2936_s24, %s2515_s27 }
  0xe8   : > { %p2512_p1 = pnand %p2510_p12, %p2496_p8  ;;  %p2518_p13 = scmp.lt.s32.totalorder %s2516_s2, %s2509_s28 }
  0xea   : > { %p2513_p10 = pneg %p2512_p1  ;;  %p2519_p0 = por %p2518_p13, %p2517_p4 }
  0xec   : > { %p2520_p2 = pnand %p2519_p0, %p2513_p10 }
  0xee   : > { %2523 = shalt.err (!%p2520_p2)
}
  0xef   : > { %s3297_s17 = smov 4   ;;  %s3298_s20 = smov 64  }
  0xf0   : > { %2085 = dma.hbm_to_vmem [thread:$0]  (!%p2927_p11), %s2934_s9, 1216, %s2936_s24, %s2938_s29, %s3298_s20, %s3298_s20, %s3297_s17  }
  0xf1   : > { %p3299_p8 = scmp.ne.s32.totalorder %s3287_s16, 0 }
  0xf2   : > { %s2972_s25 = sand.u32 (!%p3299_p8), 1, %s2598_s10  }
  0xf3   : > { %386 = sbr.rel (%p3299_p8) target bundleno = 1543 (0x607), region = 56  ;;  %s389_s1 = scalar_lea.sflag (!%p3299_p8), [#allocation3], %s2972_s25 }
  0xf4   : > { %s2019_s22 = smul.u32 (!%p3299_p8), 76, %s2972_s25 }
  0xf6   : > { %s2976_s28 = scalar_lea.vmem (!%p3299_p8), [#allocation2], %s2019_s22 }
  0xfa   : > { %2569 = dma.done.wait (%p2911_p5), %s389_s1, 1216  }
  0xfb   : > { %2571 = vsyncadd (%p2911_p5), %s389_s1, 4294966080  ;;  %p3300_p4 = scmp.eq.s32.totalorder %s2693_s15, 0 }
  0xfd   : > { %2573 = dma.done.wait (%p3300_p4), [#allocation6], 1040   ;;  %p3301_p10 = pmov %p3300_p4 }
  0xfe   : > { %p3302_p11 = pmov %p3300_p4 }
  0xff   : > { %2575 = vsyncadd (%p3301_p10), [#allocation6], 4294966256 }
 0x100   : > { %2577 = dma.done.wait (%p3302_p11), [#allocation9], 1040   ;;  %p3303_p3 = pmov %p3300_p4 }
 0x102   : > { %2579 = vsyncadd (%p3303_p3), [#allocation9], 4294966256  ;;  %p3304_p6 = pmov %p3303_p3 }
 0x103   : > { %p3305_p7 = pmov %p3303_p3 }
 0x104   : > { %2581 = dma.done.wait (%p3304_p6), [#allocation12], 1040  }
 0x105   : > { %2583 = vsyncadd (%p3305_p7), [#allocation12], 4294966256  ;;  %p3306_p5 = pmov %p3303_p3 }
 0x106   : > { %p3307_p9 = pmov %p3303_p3 }
 0x107   : > { %2585 = dma.done.wait (%p3306_p5), [#allocation15], 1040  }
 0x108   : > { %2587 = vsyncadd (%p3307_p9), [#allocation15], 4294966256  ;;  %v2152_v0 = vld [vmem:[#allocation5] sm:$0xff]   ;;  %v2153_v1 = vld [vmem:[#allocation5 + $0x8] sm:$0xff]   ;;  %s2020_s16 = smul.u32 152, %s2972_s25  ;;  %s3308_s21 = sld [smem:[#allocation26_spill]] }
 0x109   : > { %1874 = vmatprep.subr.bf16.mxu0 %v2152_v0  ;;  %v2154_v2 = vld [vmem:[#allocation5 + $0x10] sm:$0xff]   ;;  %v2155_v3 = vld [vmem:[#allocation5 + $0x18] sm:$0xff]   ;;  %v2156_v5 = vld [vmem:[#allocation5 + $0x20] sm:$0xff]   ;;  %s1801_s26 = smul.u32 2432, %s2693_s15  ;;  %s1568_s15 = scalar_lea.sflag [#allocation4], %s2972_s25 }
 0x10a   : > { %1875 = vmatpush3.bf16.msra.mxu0 %v2152_v0  ;;  %v2160_v4 = vld [vmem:[%s2976_s28] sm:$0xff]   ;;  %v2161_v13 = vld [vmem:[%s2976_s28 + $0x8] sm:$0xff]   ;;  %v2162_v15 = vld [vmem:[%s2976_s28 + $0x10] sm:$0xff]   ;;  %s3178_s18 = scalar_lea.vmem [#allocation17], %s2020_s16  ;;  %p3309_p1 = scmp.ne.s32.totalorder %s3294_s14, 0 }
 0x10b   : > { %1876 = vmatprep.subr.bf16.mxu0 %v2153_v1  ;;  %1890 = vmatprep.mubr.bf16.mxu0 %v2160_v4  ;;  %v2157_v6 = vld [vmem:[#allocation5 + $0x28] sm:$0xff]   ;;  %v2158_v9 = vld [vmem:[#allocation5 + $0x30] sm:$0xff]   ;;  %v2159_v11 = vld [vmem:[#allocation5 + $0x38] sm:$0xff]   ;;  %s1581_s9 = sshll.u32 %s3178_s18, 4  ;;  %s2619_s17 = smov [#allocation17]   ;;  %s3221_s9 = int_to_ptr.vmem [resolvable:$true] %s1581_s9 }
 0x10c   : > { %v2170_v7 = vld [vmem:[#allocation8] sm:$0xff]   ;;  %v2171_v8 = vld [vmem:[#allocation8 + $0x8] sm:$0xff]   ;;  %v2172_v10 = vld [vmem:[#allocation8 + $0x10] sm:$0xff]   ;;  %s2524_s2 = scalar_lea.vmem %s3221_s9, 2432  ;;  %s2528_s20 = sshll.u32 %s2619_s17, 4  ;;  %s2529_s20 = int_to_ptr.vmem [resolvable:$false] %s2528_s20 }
 0x10d   : > { %1910 = vmatprep.subr.bf16.mxu1 %v2170_v7  ;;  %v2173_v12 = vld [vmem:[#allocation8 + $0x18] sm:$0xff]   ;;  %v2174_v14 = vld [vmem:[#allocation8 + $0x20] sm:$0xff]   ;;  %v2175_v16 = vld [vmem:[#allocation8 + $0x28] sm:$0xff]   ;;  %p2525_p12 = scmp.ne.s32.totalorder %s3221_s9, %s2524_s2  ;;  %s2530_s22 = scalar_lea.vmem %s2529_s20, 4864 }
 0x10e   : > { %1877 = vmatpush3.bf16.msra.mxu0 %v2153_v1  ;;  %1911 = vmatpush3.bf16.msra.mxu1 %v2170_v7  ;;  %v2163_v17 = vld [vmem:[%s2976_s28 + $0x18] sm:$0xff]   ;;  %v2164_v18 = vld [vmem:[%s2976_s28 + $0x20] sm:$0xff]   ;;  %v2165_v19 = vld [vmem:[%s2976_s28 + $0x28] sm:$0xff]   ;;  %s3219_s27 = scalar_lea.hbm %s3308_s21, %s1801_s26  ;;  %p2531_p2 = scmp.lt.s32.totalorder %s3221_s9, %s2529_s20 }
 0x10f   : > { %1878 = vmatprep.subr.bf16.mxu0 %v2154_v2  ;;  %1912 = vmatprep.subr.bf16.mxu1 %v2171_v8  ;;  %v2166_v20 = vld [vmem:[%s2976_s28 + $0x30] sm:$0xff]   ;;  %v2167_v21 = vld [vmem:[%s2976_s28 + $0x38] sm:$0xff]   ;;  %v2168_v22 = vld [vmem:[%s2976_s28 + $0x40] sm:$0xff]   ;;  %p2526_p13 = pnand %p2525_p12, %p3309_p1  ;;  %p2532_p8 = scmp.lt.s32.totalorder %s2530_s22, %s2524_s2 }
 0x110   : > { %v2169_v23 = vld [vmem:[%s2976_s28 + $0x48] ss:$0 sps:$4 sm:$0xff]   ;;  %v2176_v24 = vld [vmem:[#allocation8 + $0x30] sm:$0xff]   ;;  %v2178_v26 = vld [vmem:[#allocation11] sm:$0xff]  }
 0x111   : > { %v2177_v25 = vld [vmem:[#allocation8 + $0x38] sm:$0xff]   ;;  %v2179_v27 = vld [vmem:[#allocation11 + $0x8] sm:$0xff]   ;;  %v2182_v30 = vld [vmem:[#allocation11 + $0x20] sm:$0xff]   ;;  %p2527_p0 = pneg %p2526_p13  ;;  %p2533_p4 = por %p2532_p8, %p2531_p2 }
 0x112   : > { %1879 = vmatpush3.bf16.msra.mxu0 %v2154_v2  ;;  %1913 = vmatpush3.bf16.msra.mxu1 %v2171_v8  ;;  %v2180_v28 = vld [vmem:[#allocation11 + $0x10] sm:$0xff]   ;;  %v2181_v29 = vld [vmem:[#allocation11 + $0x18] sm:$0xff]   ;;  %v2183_v31 = vld [vmem:[#allocation11 + $0x28] sm:$0xff]  }
 0x113   : > { %1880 = vmatprep.subr.bf16.mxu0 %v2155_v3  ;;  %1914 = vmatprep.subr.bf16.mxu1 %v2172_v10  ;;  %v3008_v32 = vld [vmem:[#allocation7] ss:$0 sm:$0xff]  ;;  %p2534_p10 = pnand %p2533_p4, %p2527_p0 }
 0x116   : > { %1881 = vmatpush3.bf16.msra.mxu0 %v2155_v3  ;;  %1915 = vmatpush3.bf16.msra.mxu1 %v2172_v10 }
 0x117   : > { %1882 = vmatprep.subr.bf16.mxu0 %v2156_v5  ;;  %1916 = vmatprep.subr.bf16.mxu1 %v2173_v12 }
 0x11a   : > { %1883 = vmatpush3.bf16.msra.mxu0 %v2156_v5  ;;  %1917 = vmatpush3.bf16.msra.mxu1 %v2173_v12 }
 0x11b   : > { %1884 = vmatprep.subr.bf16.mxu0 %v2157_v6  ;;  %1918 = vmatprep.subr.bf16.mxu1 %v2174_v14 }
 0x11e   : > { %1885 = vmatpush3.bf16.msra.mxu0 %v2157_v6  ;;  %1919 = vmatpush3.bf16.msra.mxu1 %v2174_v14 }
 0x11f   : > { %1886 = vmatprep.subr.bf16.mxu0 %v2158_v9  ;;  %1920 = vmatprep.subr.bf16.mxu1 %v2175_v16 }
 0x122   : > { %1887 = vmatpush3.bf16.msra.mxu0 %v2158_v9  ;;  %1921 = vmatpush3.bf16.msra.mxu1 %v2175_v16 }
 0x123   : > { %1888 = vmatprep.subr.bf16.mxu0 %v2159_v11  ;;  %1922 = vmatprep.subr.bf16.mxu1 %v2176_v24 }
 0x126   : > { %1889 = vmatpush3.bf16.msra.mxu0 %v2159_v11  ;;  %1923 = vmatpush3.bf16.msra.mxu1 %v2176_v24 }
 0x127   : > { %1924 = vmatprep.subr.bf16.mxu1 %v2177_v25  ;;  %1946 = vmatprep.subr.bf16.mxu0 %v2178_v26 }
 0x129   : > { %1891 = vmatmul.mubr.bf16.vlgmr.msra.gmra.mrb[0].mxu0 %v2161_v13 }
 0x12a   : > { %1894 = vmatprep.mubr.bf16.mxu0 %v2162_v15  ;;  %1925 = vmatpush3.bf16.msra.mxu1 %v2177_v25 }
 0x12b   : > { %1947 = vmatpush3.bf16.msra.mxu0 %v2178_v26 }
 0x12c   : > { %1948 = vmatprep.subr.bf16.mxu0 %v2179_v27 }
 0x12f   : > { %1949 = vmatpush3.bf16.msra.mxu0 %v2179_v27 }
 0x130   : > { %1950 = vmatprep.subr.bf16.mxu0 %v2180_v28 }
 0x131   : > { %1895 = vmatmul.mubr.bf16.gmra.mrb[4].mxu0 %v2163_v17 }
 0x132   : > { %1898 = vmatprep.mubr.bf16.mxu0 %v2164_v18 }
 0x133   : > { %1951 = vmatpush3.bf16.msra.mxu0 %v2180_v28 }
 0x134   : > { %1952 = vmatprep.subr.bf16.mxu0 %v2181_v29 }
 0x137   : > { %1953 = vmatpush3.bf16.msra.mxu0 %v2181_v29 }
 0x138   : > { %1954 = vmatprep.subr.bf16.mxu0 %v2182_v30 }
 0x139   : > { %1899 = vmatmul.mubr.bf16.gmra.mrb[8].mxu0 %v2165_v19 }
 0x13a   : > { %1902 = vmatprep.mubr.bf16.mxu0 %v2166_v20 }
 0x13b   : > { %1955 = vmatpush3.bf16.msra.mxu0 %v2182_v30 }
 0x13c   : > { %1956 = vmatprep.subr.bf16.mxu0 %v2183_v31 }
 0x13f   : > { %1957 = vmatpush3.bf16.msra.mxu0 %v2183_v31 }
 0x141   : > { %1903 = vmatmul.mubr.bf16.gmra.mrb[12].mxu0 %v2167_v21 }
 0x142   : > { %1906 = vmatprep.mubr.bf16.mxu0 %v2168_v22 }
 0x149   : > { %1907 = vmatmul.mubr.bf16.gmra.mrb[16].mxu0 %v2169_v23 }
 0x1fc   : > { %v1892_v33 = vpop.f32.mrb[0].mxu0 }
 0x1fd   : > { %v653_v34 = vadd.f32 %v1892_v33, %v3008_v32  ;;  %v644_v35 = vpop.f32.mrb[1].mxu0 }
 0x1fe   : > { %v645_v36 = vadd.f32 %v3008_v32, %v644_v35  ;;  %v1893_v37 = vpop.f32.mrb[2].mxu0 }
 0x1ff   : > { %v656_v38 = vadd.f32 %v1893_v37, %v3008_v32  ;;  %v647_v39 = vpop.f32.mrb[3].mxu0  ;;  %v724_v41 = vmax.f32 %v653_v34, 0.0 }
 0x200   : > { %v648_v40 = vadd.f32 %v3008_v32, %v647_v39  ;;  %v722_v43 = vmax.f32 %v645_v36, 0.0  ;;  %v2185_v39 = vld [vmem:[#allocation11 + $0x38] sm:$0xff]  }
 0x201   : > { %v725_v42 = vmax.f32 %v656_v38, 0.0  ;;  %v2184_v38 = vld [vmem:[#allocation11 + $0x30] sm:$0xff]  }
 0x202   : > { %v723_v44 = vmax.f32 %v648_v40, 0.0  ;;  %1958 = vmatprep.subr.bf16.mxu0 %v2184_v38  ;;  %v2186_v40 = vld [vmem:[#allocation14] sm:$0xff]  }
 0x203   : > { %v742_v45 = vpack.c.bf16 %v725_v42, %v724_v41  ;;  %1959 = vmatpush3.bf16.msra.mxu0 %v2184_v38  ;;  %v2187_v41 = vld [vmem:[#allocation14 + $0x8] sm:$0xff]   ;;  %1982 = vmatprep.subr.bf16.mxu1 %v2186_v40  ;;  %v2188_v42 = vld [vmem:[#allocation14 + $0x10] sm:$0xff]  }
 0x204   : > { %v1896_v46 = vpop.f32.mrb[4].mxu0  ;;  %v741_v47 = vpack.c.bf16 %v723_v44, %v722_v43  ;;  %1960 = vmatprep.subr.bf16.mxu0 %v2185_v39  ;;  %v2190_v43 = vld [vmem:[#allocation14 + $0x20] sm:$0xff]   ;;  %v2191_v44 = vld [vmem:[#allocation14 + $0x28] sm:$0xff]  }
 0x205   : > { %v669_v48 = vadd.f32 %v1896_v46, %v3008_v32  ;;  %v660_v49 = vpop.f32.mrb[5].mxu0 }
 0x206   : > { %v661_v50 = vadd.f32 %v3008_v32, %v660_v49  ;;  %v1897_v51 = vpop.f32.mrb[6].mxu0  ;;  %1926 = vmatprep.mubr.bf16.mxu1 %v741_v47 }
 0x207   : > { %v672_v52 = vadd.f32 %v1897_v51, %v3008_v32  ;;  %v663_v53 = vpop.f32.mrb[7].mxu0  ;;  %1927 = vmatmul.mubr.bf16.vlgmr.msra.gmra.mrb[0].mxu1 %v742_v45  ;;  %v728_v55 = vmax.f32 %v669_v48, 0.0  ;;  %1961 = vmatpush3.bf16.msra.mxu0 %v2185_v39  ;;  %v3029_v45 = vld [vmem:[#allocation10] ss:$0 sm:$0xff] }
 0x208   : > { %v664_v54 = vadd.f32 %v3008_v32, %v663_v53  ;;  %v726_v57 = vmax.f32 %v661_v50, 0.0  ;;  %1983 = vmatpush3.bf16.msra.mxu1 %v2186_v40 }
 0x209   : > { %v729_v56 = vmax.f32 %v672_v52, 0.0  ;;  %1984 = vmatprep.subr.bf16.mxu1 %v2187_v41 }
 0x20a   : > { %v727_v58 = vmax.f32 %v664_v54, 0.0 }
 0x20b   : > { %v744_v59 = vpack.c.bf16 %v729_v56, %v728_v55 }
 0x20c   : > { %v743_v60 = vpack.c.bf16 %v727_v58, %v726_v57  ;;  %v1900_v61 = vpop.f32.mrb[8].mxu0  ;;  %1985 = vmatpush3.bf16.msra.mxu1 %v2187_v41 }
 0x20d   : > { %v685_v62 = vadd.f32 %v1900_v61, %v3008_v32  ;;  %v676_v63 = vpop.f32.mrb[9].mxu0  ;;  %1986 = vmatprep.subr.bf16.mxu1 %v2188_v42 }
 0x20e   : > { %v677_v0 = vadd.f32 %v3008_v32, %v676_v63  ;;  %v1901_v1 = vpop.f32.mrb[10].mxu0  ;;  %1930 = vmatprep.mubr.bf16.mxu1 %v743_v60 }
 0x20f   : > { %v688_v2 = vadd.f32 %v1901_v1, %v3008_v32  ;;  %v679_v3 = vpop.f32.mrb[11].mxu0  ;;  %1931 = vmatmul.mubr.bf16.gmra.mrb[4].mxu1 %v744_v59  ;;  %v732_v5 = vmax.f32 %v685_v62, 0.0 }
 0x210   : > { %v680_v4 = vadd.f32 %v3008_v32, %v679_v3  ;;  %v730_v7 = vmax.f32 %v677_v0, 0.0  ;;  %1987 = vmatpush3.bf16.msra.mxu1 %v2188_v42 }
 0x211   : > { %v733_v6 = vmax.f32 %v688_v2, 0.0 }
 0x212   : > { %v731_v8 = vmax.f32 %v680_v4, 0.0 }
 0x213   : > { %v746_v9 = vpack.c.bf16 %v733_v6, %v732_v5 }
 0x214   : > { %v745_v10 = vpack.c.bf16 %v731_v8, %v730_v7  ;;  %v1904_v11 = vpop.f32.mrb[12].mxu0 }
 0x215   : > { %v701_v12 = vadd.f32 %v1904_v11, %v3008_v32  ;;  %v692_v13 = vpop.f32.mrb[13].mxu0 }
 0x216   : > { %v693_v14 = vadd.f32 %v3008_v32, %v692_v13  ;;  %v1905_v15 = vpop.f32.mrb[14].mxu0  ;;  %1934 = vmatprep.mubr.bf16.mxu1 %v745_v10 }
 0x217   : > { %v704_v16 = vadd.f32 %v1905_v15, %v3008_v32  ;;  %v695_v17 = vpop.f32.mrb[15].mxu0  ;;  %1935 = vmatmul.mubr.bf16.gmra.mrb[8].mxu1 %v746_v9  ;;  %v736_v19 = vmax.f32 %v701_v12, 0.0 }
 0x218   : > { %v696_v18 = vadd.f32 %v3008_v32, %v695_v17  ;;  %v734_v21 = vmax.f32 %v693_v14, 0.0 }
 0x219   : > { %v737_v20 = vmax.f32 %v704_v16, 0.0 }
 0x21a   : > { %v735_v22 = vmax.f32 %v696_v18, 0.0 }
 0x21b   : > { %v748_v23 = vpack.c.bf16 %v737_v20, %v736_v19 }
 0x21c   : > { %v747_v24 = vpack.c.bf16 %v735_v22, %v734_v21  ;;  %v1908_v25 = vpop.f32.mrb[16].mxu0 }
 0x21d   : > { %v717_v26 = vadd.f32 %v1908_v25, %v3008_v32  ;;  %v708_v27 = vpop.f32.mrb[17].mxu0 }
 0x21e   : > { %v709_v28 = vadd.f32 %v3008_v32, %v708_v27  ;;  %v1909_v29 = vpop.f32.mrb[18].mxu0  ;;  %1938 = vmatprep.mubr.bf16.mxu1 %v747_v24 }
 0x21f   : > { %v711_v30 = vpop.f32.mrb[19].mxu0  ;;  %1939 = vmatmul.mubr.bf16.gmra.mrb[12].mxu1 %v748_v23  ;;  %v740_v33 = vmax.f32 %v717_v26, 0.0 }
 0x220   : > { %v712_v31 = vadd.f32 %v3008_v32, %v711_v30  ;;  %v738_v34 = vmax.f32 %v709_v28, 0.0  ;;  %v2189_v32 = vld [vmem:[#allocation14 + $0x18] sm:$0xff]  }
 0x221   : > { %v750_v37 = vpack.c.bf16 %v740_v33, %v740_v33  ;;  %1988 = vmatprep.subr.bf16.mxu1 %v2189_v32 }
 0x222   : > { %v739_v35 = vmax.f32 %v712_v31, 0.0  ;;  %1989 = vmatpush3.bf16.msra.mxu1 %v2189_v32 }
 0x223   : > { %1990 = vmatprep.subr.bf16.mxu1 %v2190_v43 }
 0x224   : > { %v749_v36 = vpack.c.bf16 %v739_v35, %v738_v34 }
 0x226   : > { %1942 = vmatprep.mubr.bf16.mxu1 %v749_v36  ;;  %1991 = vmatpush3.bf16.msra.mxu1 %v2190_v43 }
 0x227   : > { %1943 = vmatmul.mubr.bf16.gmra.mrb[16].mxu1 %v750_v37  ;;  %1992 = vmatprep.subr.bf16.mxu1 %v2191_v44 }
 0x22a   : > { %1993 = vmatpush3.bf16.msra.mxu1 %v2191_v44 }
 0x2da   : > { %v1928_v46 = vpop.f32.mrb[0].mxu1 }
 0x2db   : > { %v865_v47 = vadd.f32 %v1928_v46, %v3029_v45  ;;  %v856_v48 = vpop.f32.mrb[1].mxu1 }
 0x2dc   : > { %v857_v49 = vadd.f32 %v3029_v45, %v856_v48  ;;  %v1929_v50 = vpop.f32.mrb[2].mxu1 }
 0x2dd   : > { %v868_v51 = vadd.f32 %v1929_v50, %v3029_v45  ;;  %v859_v52 = vpop.f32.mrb[3].mxu1  ;;  %v936_v54 = vmax.f32 %v865_v47, 0.0 }
 0x2de   : > { %v860_v53 = vadd.f32 %v3029_v45, %v859_v52  ;;  %v934_v56 = vmax.f32 %v857_v49, 0.0  ;;  %v2193_v52 = vld [vmem:[#allocation14 + $0x38] sm:$0xff]  }
 0x2df   : > { %v937_v55 = vmax.f32 %v868_v51, 0.0  ;;  %v2192_v51 = vld [vmem:[#allocation14 + $0x30] sm:$0xff]  }
 0x2e0   : > { %v935_v57 = vmax.f32 %v860_v53, 0.0  ;;  %1994 = vmatprep.subr.bf16.mxu1 %v2192_v51  ;;  %v3050_v53 = vld [vmem:[#allocation13] ss:$0 sm:$0xff] }
 0x2e1   : > { %v954_v58 = vpack.c.bf16 %v937_v55, %v936_v54  ;;  %1995 = vmatpush3.bf16.msra.mxu1 %v2192_v51 }
 0x2e2   : > { %v953_v59 = vpack.c.bf16 %v935_v57, %v934_v56  ;;  %v1932_v60 = vpop.f32.mrb[4].mxu1  ;;  %1996 = vmatprep.subr.bf16.mxu1 %v2193_v52 }
 0x2e3   : > { %v881_v61 = vadd.f32 %v1932_v60, %v3029_v45  ;;  %v872_v62 = vpop.f32.mrb[5].mxu1 }
 0x2e4   : > { %v873_v63 = vadd.f32 %v3029_v45, %v872_v62  ;;  %v1933_v0 = vpop.f32.mrb[6].mxu1  ;;  %1962 = vmatprep.mubr.bf16.mxu0 %v953_v59 }
 0x2e5   : > { %v884_v1 = vadd.f32 %v1933_v0, %v3029_v45  ;;  %v875_v2 = vpop.f32.mrb[7].mxu1  ;;  %1963 = vmatmul.mubr.bf16.vlgmr.msra.gmra.mrb[20].mxu0 %v954_v58  ;;  %v940_v4 = vmax.f32 %v881_v61, 0.0  ;;  %1997 = vmatpush3.bf16.msra.mxu1 %v2193_v52 }
 0x2e6   : > { %v876_v3 = vadd.f32 %v3029_v45, %v875_v2  ;;  %v938_v6 = vmax.f32 %v873_v63, 0.0 }
 0x2e7   : > { %v941_v5 = vmax.f32 %v884_v1, 0.0 }
 0x2e8   : > { %v939_v7 = vmax.f32 %v876_v3, 0.0 }
 0x2e9   : > { %v956_v8 = vpack.c.bf16 %v941_v5, %v940_v4 }
 0x2ea   : > { %v955_v9 = vpack.c.bf16 %v939_v7, %v938_v6  ;;  %v1936_v10 = vpop.f32.mrb[8].mxu1 }
 0x2eb   : > { %v897_v11 = vadd.f32 %v1936_v10, %v3029_v45  ;;  %v888_v12 = vpop.f32.mrb[9].mxu1 }
 0x2ec   : > { %v889_v13 = vadd.f32 %v3029_v45, %v888_v12  ;;  %v1937_v14 = vpop.f32.mrb[10].mxu1  ;;  %1966 = vmatprep.mubr.bf16.mxu0 %v955_v9 }
 0x2ed   : > { %v900_v15 = vadd.f32 %v1937_v14, %v3029_v45  ;;  %v891_v16 = vpop.f32.mrb[11].mxu1  ;;  %1967 = vmatmul.mubr.bf16.gmra.mrb[24].mxu0 %v956_v8  ;;  %v944_v18 = vmax.f32 %v897_v11, 0.0 }
 0x2ee   : > { %v892_v17 = vadd.f32 %v3029_v45, %v891_v16  ;;  %v942_v20 = vmax.f32 %v889_v13, 0.0 }
 0x2ef   : > { %v945_v19 = vmax.f32 %v900_v15, 0.0 }
 0x2f0   : > { %v943_v21 = vmax.f32 %v892_v17, 0.0 }
 0x2f1   : > { %v958_v22 = vpack.c.bf16 %v945_v19, %v944_v18 }
 0x2f2   : > { %v957_v23 = vpack.c.bf16 %v943_v21, %v942_v20  ;;  %v1940_v24 = vpop.f32.mrb[12].mxu1 }
 0x2f3   : > { %v913_v25 = vadd.f32 %v1940_v24, %v3029_v45  ;;  %v904_v26 = vpop.f32.mrb[13].mxu1 }
 0x2f4   : > { %v905_v27 = vadd.f32 %v3029_v45, %v904_v26  ;;  %v1941_v28 = vpop.f32.mrb[14].mxu1  ;;  %1970 = vmatprep.mubr.bf16.mxu0 %v957_v23 }
 0x2f5   : > { %v916_v29 = vadd.f32 %v1941_v28, %v3029_v45  ;;  %v907_v30 = vpop.f32.mrb[15].mxu1  ;;  %1971 = vmatmul.mubr.bf16.gmra.mrb[28].mxu0 %v958_v22  ;;  %v948_v33 = vmax.f32 %v913_v25, 0.0 }
 0x2f6   : > { %v908_v31 = vadd.f32 %v3029_v45, %v907_v30  ;;  %v946_v35 = vmax.f32 %v905_v27, 0.0 }
 0x2f7   : > { %v949_v34 = vmax.f32 %v916_v29, 0.0 }
 0x2f8   : > { %v947_v36 = vmax.f32 %v908_v31, 0.0 }
 0x2f9   : > { %v960_v37 = vpack.c.bf16 %v949_v34, %v948_v33 }
 0x2fa   : > { %v959_v38 = vpack.c.bf16 %v947_v36, %v946_v35  ;;  %v1944_v39 = vpop.f32.mrb[16].mxu1 }
 0x2fb   : > { %v929_v40 = vadd.f32 %v1944_v39, %v3029_v45  ;;  %v920_v41 = vpop.f32.mrb[17].mxu1 }
 0x2fc   : > { %v921_v42 = vadd.f32 %v3029_v45, %v920_v41  ;;  %v1945_v32 = vpop.f32.mrb[18].mxu1  ;;  %1974 = vmatprep.mubr.bf16.mxu0 %v959_v38 }
 0x2fd   : > { %v923_v43 = vpop.f32.mrb[19].mxu1  ;;  %1975 = vmatmul.mubr.bf16.gmra.mrb[32].mxu0 %v960_v37  ;;  %v952_v46 = vmax.f32 %v929_v40, 0.0 }
 0x2fe   : > { %v924_v44 = vadd.f32 %v3029_v45, %v923_v43  ;;  %v950_v47 = vmax.f32 %v921_v42, 0.0 }
 0x2ff   : > { %v962_v50 = vpack.c.bf16 %v952_v46, %v952_v46 }
 0x300   : > { %v951_v48 = vmax.f32 %v924_v44, 0.0 }
 0x302   : > { %v961_v49 = vpack.c.bf16 %v951_v48, %v950_v47 }
 0x304   : > { %1978 = vmatprep.mubr.bf16.mxu0 %v961_v49 }
 0x305   : > { %1979 = vmatmul.mubr.bf16.gmra.mrb[36].mxu0 %v962_v50 }
 0x3b8   : > { %v1964_v54 = vpop.f32.mrb[20].mxu0 }
 0x3b9   : > { %v1077_v55 = vadd.f32 %v1964_v54, %v3050_v53  ;;  %v1068_v56 = vpop.f32.mrb[21].mxu0 }
 0x3ba   : > { %v1069_v45 = vadd.f32 %v3050_v53, %v1068_v56  ;;  %v1965_v57 = vpop.f32.mrb[22].mxu0 }
 0x3bb   : > { %v1080_v58 = vadd.f32 %v1965_v57, %v3050_v53  ;;  %v1071_v59 = vpop.f32.mrb[23].mxu0  ;;  %v1148_v61 = vmax.f32 %v1077_v55, 0.0 }
 0x3bc   : > { %v1072_v60 = vadd.f32 %v3050_v53, %v1071_v59  ;;  %v1146_v63 = vmax.f32 %v1069_v45, 0.0 }
 0x3bd   : > { %v1149_v62 = vmax.f32 %v1080_v58, 0.0  ;;  %v1788_v58 = vld [vmem:[#allocation16] ss:$0 sm:$0xff] }
 0x3be   : > { %v1147_v0 = vmax.f32 %v1072_v60, 0.0 }
 0x3bf   : > { %v1166_v1 = vpack.c.bf16 %v1149_v62, %v1148_v61 }
 0x3c0   : > { %v1165_v2 = vpack.c.bf16 %v1147_v0, %v1146_v63  ;;  %v1968_v3 = vpop.f32.mrb[24].mxu0 }
 0x3c1   : > { %v1093_v4 = vadd.f32 %v1968_v3, %v3050_v53  ;;  %v1084_v5 = vpop.f32.mrb[25].mxu0 }
 0x3c2   : > { %v1085_v6 = vadd.f32 %v3050_v53, %v1084_v5  ;;  %v1969_v7 = vpop.f32.mrb[26].mxu0  ;;  %1998 = vmatprep.mubr.bf16.mxu1 %v1165_v2 }
 0x3c3   : > { %v1096_v8 = vadd.f32 %v1969_v7, %v3050_v53  ;;  %v1087_v9 = vpop.f32.mrb[27].mxu0  ;;  %1999 = vmatmul.mubr.bf16.vlgmr.msra.gmra.mrb[20].mxu1 %v1166_v1  ;;  %v1152_v11 = vmax.f32 %v1093_v4, 0.0 }
 0x3c4   : > { %v1088_v10 = vadd.f32 %v3050_v53, %v1087_v9  ;;  %v1150_v13 = vmax.f32 %v1085_v6, 0.0 }
 0x3c5   : > { %v1153_v12 = vmax.f32 %v1096_v8, 0.0 }
 0x3c6   : > { %v1151_v14 = vmax.f32 %v1088_v10, 0.0 }
 0x3c7   : > { %v1168_v15 = vpack.c.bf16 %v1153_v12, %v1152_v11 }
 0x3c8   : > { %v1167_v16 = vpack.c.bf16 %v1151_v14, %v1150_v13  ;;  %v1972_v17 = vpop.f32.mrb[28].mxu0 }
 0x3c9   : > { %v1109_v18 = vadd.f32 %v1972_v17, %v3050_v53  ;;  %v1100_v19 = vpop.f32.mrb[29].mxu0 }
 0x3ca   : > { %v1101_v20 = vadd.f32 %v3050_v53, %v1100_v19  ;;  %v1973_v21 = vpop.f32.mrb[30].mxu0  ;;  %2002 = vmatprep.mubr.bf16.mxu1 %v1167_v16 }
 0x3cb   : > { %v1112_v22 = vadd.f32 %v1973_v21, %v3050_v53  ;;  %v1103_v23 = vpop.f32.mrb[31].mxu0  ;;  %2003 = vmatmul.mubr.bf16.gmra.mrb[24].mxu1 %v1168_v15  ;;  %v1156_v25 = vmax.f32 %v1109_v18, 0.0 }
 0x3cc   : > { %v1104_v24 = vadd.f32 %v3050_v53, %v1103_v23  ;;  %v1154_v27 = vmax.f32 %v1101_v20, 0.0 }
 0x3cd   : > { %v1157_v26 = vmax.f32 %v1112_v22, 0.0 }
 0x3ce   : > { %v1155_v28 = vmax.f32 %v1104_v24, 0.0 }
 0x3cf   : > { %v1170_v29 = vpack.c.bf16 %v1157_v26, %v1156_v25 }
 0x3d0   : > { %v1169_v30 = vpack.c.bf16 %v1155_v28, %v1154_v27  ;;  %v1976_v31 = vpop.f32.mrb[32].mxu0 }
 0x3d1   : > { %v1125_v33 = vadd.f32 %v1976_v31, %v3050_v53  ;;  %v1116_v34 = vpop.f32.mrb[33].mxu0 }
 0x3d2   : > { %v1117_v35 = vadd.f32 %v3050_v53, %v1116_v34  ;;  %v1977_v36 = vpop.f32.mrb[34].mxu0  ;;  %2006 = vmatprep.mubr.bf16.mxu1 %v1169_v30 }
 0x3d3   : > { %v1128_v37 = vadd.f32 %v1977_v36, %v3050_v53  ;;  %v1119_v38 = vpop.f32.mrb[35].mxu0  ;;  %2007 = vmatmul.mubr.bf16.gmra.mrb[28].mxu1 %v1170_v29  ;;  %v1160_v40 = vmax.f32 %v1125_v33, 0.0 }
 0x3d4   : > { %v1120_v39 = vadd.f32 %v3050_v53, %v1119_v38  ;;  %v1158_v42 = vmax.f32 %v1117_v35, 0.0 }
 0x3d5   : > { %v1161_v41 = vmax.f32 %v1128_v37, 0.0 }
 0x3d6   : > { %v1159_v32 = vmax.f32 %v1120_v39, 0.0 }
 0x3d7   : > { %v1172_v43 = vpack.c.bf16 %v1161_v41, %v1160_v40 }
 0x3d8   : > { %v1171_v44 = vpack.c.bf16 %v1159_v32, %v1158_v42  ;;  %v1980_v46 = vpop.f32.mrb[36].mxu0 }
 0x3d9   : > { %v1141_v47 = vadd.f32 %v1980_v46, %v3050_v53  ;;  %v1132_v48 = vpop.f32.mrb[37].mxu0 }
 0x3da   : > { %v1133_v49 = vadd.f32 %v3050_v53, %v1132_v48  ;;  %v1981_v50 = vpop.f32.mrb[38].mxu0  ;;  %2010 = vmatprep.mubr.bf16.mxu1 %v1171_v44 }
 0x3db   : > { %v1135_v51 = vpop.f32.mrb[39].mxu0  ;;  %2011 = vmatmul.mubr.bf16.gmra.mrb[32].mxu1 %v1172_v43  ;;  %v1164_v54 = vmax.f32 %v1141_v47, 0.0 }
 0x3dc   : > { %v1136_v52 = vadd.f32 %v3050_v53, %v1135_v51  ;;  %v1162_v55 = vmax.f32 %v1133_v49, 0.0 }
 0x3dd   : > { %v1174_v57 = vpack.c.bf16 %v1164_v54, %v1164_v54 }
 0x3de   : > { %v1163_v56 = vmax.f32 %v1136_v52, 0.0 }
 0x3e0   : > { %v1173_v45 = vpack.c.bf16 %v1163_v56, %v1162_v55 }
 0x3e2   : > { %2014 = vmatprep.mubr.bf16.mxu1 %v1173_v45 }
 0x3e3   : > { %2015 = vmatmul.mubr.bf16.gmra.mrb[36].mxu1 %v1174_v57 }
 0x496   : > { %v2000_v59 = vpop.f32.mrb[20].mxu1 }
 0x497   : > { %v1289_v60 = vadd.f32 %v2000_v59, %v1788_v58  ;;  %v1280_v61 = vpop.f32.mrb[21].mxu1 }
 0x498   : > { %v1281_v62 = vadd.f32 %v1788_v58, %v1280_v61  ;;  %v2001_v63 = vpop.f32.mrb[22].mxu1 }
 0x499   : > { %1362 = vmax.xlane.f32.xlu1 %v1289_v60  ;;  %v1283_v0 = vpop.f32.mrb[23].mxu1  ;;  %v1292_v1 = vadd.f32 %v2001_v63, %v1788_v58 }
 0x49a   : > { %1358 = vmax.xlane.f32.xlu0 %v1281_v62  ;;  %v1284_v2 = vadd.f32 %v1788_v58, %v1283_v0 }
 0x49d   : > { %1364 = vmax.xlane.f32.xlu1 %v1292_v1 }
 0x49e   : > { %v2004_v53 = vpop.f32.mrb[24].mxu1  ;;  %1360 = vmax.xlane.f32.xlu0 %v1284_v2 }
 0x49f   : > { %v1305_v3 = vadd.f32 %v2004_v53, %v1788_v58  ;;  %v1296_v4 = vpop.f32.mrb[25].mxu1 }
 0x4a0   : > { %v2005_v5 = vpop.f32.mrb[26].mxu1  ;;  %v1297_v8 = vadd.f32 %v1788_v58, %v1296_v4 }
 0x4a1   : > { %v1308_v6 = vadd.f32 %v2005_v5, %v1788_v58  ;;  %v1299_v7 = vpop.f32.mrb[27].mxu1 }
 0x4a2   : > { %1370 = vmax.xlane.f32.xlu0 %v1305_v3  ;;  %v3071_v9 = vadd.f32 %v1788_v58, %v1299_v7 }
 0x4a3   : > { %1372 = vmax.xlane.f32.xlu1 %v1308_v6 }
 0x4a6   : > { %v2008_v10 = vpop.f32.mrb[28].mxu1  ;;  %1366 = vmax.xlane.f32.xlu0 %v1297_v8 }
 0x4a7   : > { %v3073_v11 = vadd.f32 %v2008_v10, %v1788_v58  ;;  %v1312_v12 = vpop.f32.mrb[29].mxu1  ;;  %1368 = vmax.xlane.f32.xlu1 %v3071_v9 }
 0x4a8   : > { %v2009_v13 = vpop.f32.mrb[30].mxu1  ;;  %v3080_v16 = vadd.f32 %v1788_v58, %v1312_v12 }
 0x4a9   : > { %v3076_v14 = vadd.f32 %v2009_v13, %v1788_v58  ;;  %v1315_v15 = vpop.f32.mrb[31].mxu1 }
 0x4aa   : > { %1378 = vmax.xlane.f32.xlu0 %v3073_v11  ;;  %v3082_v17 = vadd.f32 %v1788_v58, %v1315_v15 }
 0x4ab   : > { %1380 = vmax.xlane.f32.xlu1 %v3076_v14 }
 0x4ae   : > { %v2012_v18 = vpop.f32.mrb[32].mxu1  ;;  %1374 = vmax.xlane.f32.xlu0 %v3080_v16 }
 0x4af   : > { %v3085_v19 = vadd.f32 %v2012_v18, %v1788_v58  ;;  %v1328_v20 = vpop.f32.mrb[33].mxu1  ;;  %1376 = vmax.xlane.f32.xlu1 %v3082_v17 }
 0x4b0   : > { %v2013_v21 = vpop.f32.mrb[34].mxu1  ;;  %v3092_v24 = vadd.f32 %v1788_v58, %v1328_v20 }
 0x4b1   : > { %v3088_v22 = vadd.f32 %v2013_v21, %v1788_v58  ;;  %v1331_v23 = vpop.f32.mrb[35].mxu1 }
 0x4b2   : > { %1386 = vmax.xlane.f32.xlu0 %v3085_v19  ;;  %v3094_v25 = vadd.f32 %v1788_v58, %v1331_v23 }
 0x4b3   : > { %1388 = vmax.xlane.f32.xlu1 %v3088_v22 }
 0x4b6   : > { %v2016_v26 = vpop.f32.mrb[36].mxu1  ;;  %1382 = vmax.xlane.f32.xlu0 %v3092_v24 }
 0x4b7   : > { %v1344_v27 = vpop.f32.mrb[37].mxu1  ;;  %1384 = vmax.xlane.f32.xlu1 %v3094_v25  ;;  %v3103_v33 = vadd.f32 %v2016_v26, %v1788_v58 }
 0x4b8   : > { %v3098_v28 = vadd.f32 %v1788_v58, %v1344_v27  ;;  %v2017_v29 = vpop.f32.mrb[38].mxu1 }
 0x4b9   : > { %v1347_v30 = vpop.f32.mrb[39].mxu1 }
 0x4ba   : > { %v3100_v31 = vadd.f32 %v1788_v58, %v1347_v30  ;;  %1390 = vmax.xlane.f32.xlu0 %v3098_v28 }
 0x4bc   : > { %1392 = vmax.xlane.f32.xlu1 %v3100_v31 }
 0x4be   : > { %1394 = vmax.xlane.f32.xlu0 %v3103_v33 }
 0x526   : > { %v1363_v34 = vpop.xlane.xlu1 %1362 }
 0x527   : > { %v3107_v35 = vsub.f32 %v1289_v60, %v1363_v34  ;;  %v1359_v36 = vpop.xlane.xlu0 %1358 }
 0x528   : > { %v3109_v37 = vsub.f32 %v1281_v62, %v1359_v36 }
 0x529   : > { %v1419_v38 = vmul.f32 1.442695, %v3107_v35 }
 0x52a   : > { %v1415_v39 = vmul.f32 1.442695, %v3109_v37  ;;  %v1365_v40 = vpop.xlane.xlu1 %1364 }
 0x52b   : > { %2194 = vpow2.f32 %v1419_v38  ;;  %v3113_v41 = vsub.f32 %v1292_v1, %v1365_v40  ;;  %v1361_v42 = vpop.xlane.xlu0 %1360 }
 0x52c   : > { %v3115_v32 = vsub.f32 %v1284_v2, %v1361_v42  ;;  %2196 = vpow2.f32 %v1415_v39 }
 0x52d   : > { %v1421_v43 = vmul.f32 1.442695, %v3113_v41 }
 0x52e   : > { %v1417_v44 = vmul.f32 1.442695, %v3115_v32 }
 0x52f   : > { %2198 = vpow2.f32 %v1421_v43  ;;  %v1371_v46 = vpop.xlane.xlu0 %1370 }
 0x530   : > { %v3119_v47 = vsub.f32 %v1305_v3, %v1371_v46  ;;  %v1373_v48 = vpop.xlane.xlu1 %1372  ;;  %2200 = vpow2.f32 %v1417_v44 }
 0x531   : > { %v3121_v49 = vsub.f32 %v1308_v6, %v1373_v48 }
 0x532   : > { %v1427_v50 = vmul.f32 1.442695, %v3119_v47 }
 0x533   : > { %v1429_v51 = vmul.f32 1.442695, %v3121_v49  ;;  %v1367_v52 = vpop.xlane.xlu0 %1366 }
 0x534   : > { %2202 = vpow2.f32 %v1427_v50  ;;  %v3125_v54 = vsub.f32 %v1297_v8, %v1367_v52  ;;  %v1369_v55 = vpop.xlane.xlu1 %1368 }
 0x535   : > { %v2195_v56 = vpop.eup %2194  ;;  %v3128_v45 = vsub.f32 %v3071_v9, %v1369_v55  ;;  %2204 = vpow2.f32 %v1429_v51 }
 0x536   : > { %v1423_v57 = vmul.f32 1.442695, %v3125_v54  ;;  %1457 = vadd.xlane.f32.xlu1 %v2195_v56  ;;  %v2197_v60 = vpop.eup %2196 }
 0x537   : > { %v1425_v58 = vmul.f32 1.442695, %v3128_v45  ;;  %v1379_v59 = vpop.xlane.xlu0 %1378 }
 0x538   : > { %2206 = vpow2.f32 %v1423_v57  ;;  %v3133_v61 = vsub.f32 %v3073_v11, %v1379_v59  ;;  %v1381_v62 = vpop.xlane.xlu1 %1380 }
 0x539   : > { %v2199_v63 = vpop.eup %2198  ;;  %v3136_v0 = vsub.f32 %v3076_v14, %v1381_v62  ;;  %2208 = vpow2.f32 %v1425_v58 }
 0x53a   : > { %v1435_v1 = vmul.f32 1.442695, %v3133_v61  ;;  %1459 = vadd.xlane.f32.xlu0 %v2199_v63  ;;  %1453 = vadd.xlane.f32.xlu1 %v2197_v60  ;;  %v2201_v5 = vpop.eup %2200 }
 0x53b   : > { %v1437_v2 = vmul.f32 1.442695, %v3136_v0  ;;  %v1375_v53 = vpop.xlane.xlu0 %1374 }
 0x53c   : > { %2210 = vpow2.f32 %v1435_v1  ;;  %v3141_v3 = vsub.f32 %v3080_v16, %v1375_v53  ;;  %v1377_v4 = vpop.xlane.xlu1 %1376 }
 0x53d   : > { %v3144_v6 = vsub.f32 %v3082_v17, %v1377_v4  ;;  %2212 = vpow2.f32 %v1437_v2 }
 0x53e   : > { %v2203_v7 = vpop.eup %2202  ;;  %v1431_v8 = vmul.f32 1.442695, %v3141_v3  ;;  %1455 = vadd.xlane.f32.xlu0 %v2201_v5 }
 0x53f   : > { %v1433_v9 = vmul.f32 1.442695, %v3144_v6  ;;  %1465 = vadd.xlane.f32.xlu1 %v2203_v7  ;;  %v1387_v10 = vpop.xlane.xlu0 %1386  ;;  %v2205_v13 = vpop.eup %2204 }
 0x540   : > { %2214 = vpow2.f32 %v1431_v8  ;;  %v3149_v11 = vsub.f32 %v3085_v19, %v1387_v10  ;;  %v1389_v12 = vpop.xlane.xlu1 %1388 }
 0x541   : > { %v3152_v14 = vsub.f32 %v3088_v22, %v1389_v12  ;;  %2216 = vpow2.f32 %v1433_v9 }
 0x542   : > { %v2207_v15 = vpop.eup %2206  ;;  %v1443_v16 = vmul.f32 1.442695, %v3149_v11  ;;  %1467 = vadd.xlane.f32.xlu0 %v2205_v13 }
 0x543   : > { %v1445_v17 = vmul.f32 1.442695, %v3152_v14  ;;  %1461 = vadd.xlane.f32.xlu1 %v2207_v15  ;;  %v1383_v18 = vpop.xlane.xlu0 %1382  ;;  %v2209_v21 = vpop.eup %2208 }
 0x544   : > { %2218 = vpow2.f32 %v1443_v16  ;;  %v3157_v20 = vsub.f32 %v3092_v24, %v1383_v18  ;;  %v1385_v19 = vpop.xlane.xlu1 %1384 }
 0x545   : > { %v3160_v23 = vsub.f32 %v3094_v25, %v1385_v19  ;;  %2220 = vpow2.f32 %v1445_v17 }
 0x546   : > { %v2211_v22 = vpop.eup %2210  ;;  %v1439_v26 = vmul.f32 1.442695, %v3157_v20  ;;  %1463 = vadd.xlane.f32.xlu0 %v2209_v21 }
 0x547   : > { %v1441_v27 = vmul.f32 1.442695, %v3160_v23  ;;  %1473 = vadd.xlane.f32.xlu1 %v2211_v22  ;;  %v1391_v29 = vpop.xlane.xlu0 %1390  ;;  %v2213_v24 = vpop.eup %2212 }
 0x548   : > { %2222 = vpow2.f32 %v1439_v26  ;;  %v3165_v30 = vsub.f32 %v3098_v28, %v1391_v29 }
 0x549   : > { %v1393_v34 = vpop.xlane.xlu1 %1392  ;;  %2224 = vpow2.f32 %v1441_v27 }
 0x54a   : > { %v2215_v36 = vpop.eup %2214  ;;  %v1447_v38 = vmul.f32 1.442695, %v3165_v30  ;;  %v3169_v25 = vsub.f32 %v3100_v31, %v1393_v34  ;;  %1475 = vadd.xlane.f32.xlu0 %v2213_v24 }
 0x54b   : > { %1469 = vadd.xlane.f32.xlu1 %v2215_v36  ;;  %v1395_v39 = vpop.xlane.xlu0 %1394  ;;  %v2217_v28 = vpop.eup %2216 }
 0x54c   : > { %2226 = vpow2.f32 %v1447_v38  ;;  %v1449_v40 = vmul.f32 1.442695, %v3169_v25  ;;  %v3173_v42 = vsub.f32 %v3103_v33, %v1395_v39 }
 0x54e   : > { %v2219_v43 = vpop.eup %2218  ;;  %2228 = vpow2.f32 %v1449_v40  ;;  %v1451_v44 = vmul.f32 1.442695, %v3173_v42  ;;  %1471 = vadd.xlane.f32.xlu0 %v2217_v28 }
 0x54f   : > { %1481 = vadd.xlane.f32.xlu1 %v2219_v43  ;;  %v2221_v31 = vpop.eup %2220 }
 0x550   : > { %2230 = vpow2.f32 %v1451_v44 }
 0x552   : > { %v2223_v46 = vpop.eup %2222  ;;  %1483 = vadd.xlane.f32.xlu0 %v2221_v31 }
 0x553   : > { %1477 = vadd.xlane.f32.xlu1 %v2223_v46  ;;  %v2225_v48 = vpop.eup %2224 }
 0x556   : > { %v2227_v50 = vpop.eup %2226  ;;  %1479 = vadd.xlane.f32.xlu0 %v2225_v48 }
 0x557   : > { %1485 = vadd.xlane.f32.xlu1 %v2227_v50 }
 0x558   : > { %v2229_v51 = vpop.eup %2228 }
 0x55a   : > { %v2231_v33 = vpop.eup %2230  ;;  %1487 = vadd.xlane.f32.xlu0 %v2229_v51 }
 0x55b   : > { %1489 = vadd.xlane.f32.xlu1 %v2231_v33 }
 0x5c3   : > { %v1458_v52 = vpop.xlane.xlu1 %1457 }
 0x5c4   : > { %2232 = vlog2.f32 %v1458_v52 }
 0x5c7   : > { %v1454_v55 = vpop.xlane.xlu1 %1453  ;;  %v1460_v56 = vpop.xlane.xlu0 %1459 }
 0x5c8   : > { %2234 = vlog2.f32 %v1454_v55 }
 0x5c9   : > { %2236 = vlog2.f32 %v1460_v56 }
 0x5cb   : > { %v1456_v57 = vpop.xlane.xlu0 %1455 }
 0x5cc   : > { %2238 = vlog2.f32 %v1456_v57  ;;  %v1466_v58 = vpop.xlane.xlu1 %1465 }
 0x5cd   : > { %2240 = vlog2.f32 %v1466_v58 }
 0x5ce   : > { %v2233_v59 = vpop.eup %2232 }
 0x5cf   : > { %v1496_v60 = vmul.f32 0.6931472, %v2233_v59  ;;  %v1468_v62 = vpop.xlane.xlu0 %1467 }
 0x5d0   : > { %2242 = vlog2.f32 %v1468_v62  ;;  %v1462_v63 = vpop.xlane.xlu1 %1461 }
 0x5d1   : > { %v1531_v1 = vsub.f32 %v3107_v35, %v1496_v60  ;;  %2244 = vlog2.f32 %v1462_v63 }
 0x5d2   : > { %v2235_v2 = vpop.eup %2234 }
 0x5d3   : > { %v2237_v53 = vpop.eup %2236  ;;  %1550 = vst [vmem:[%s3178_s18 + $0x10] sm:$0xff] %v1531_v1  ;;  %v1492_v4 = vmul.f32 0.6931472, %v2235_v2  ;;  %v1464_v5 = vpop.xlane.xlu0 %1463 }
 0x5d4   : > { %v1498_v7 = vmul.f32 0.6931472, %v2237_v53  ;;  %2246 = vlog2.f32 %v1464_v5  ;;  %v1474_v8 = vpop.xlane.xlu1 %1473 }
 0x5d5   : > { %v1529_v9 = vsub.f32 %v3109_v37, %v1492_v4  ;;  %2248 = vlog2.f32 %v1474_v8 }
 0x5d6   : > { %v2239_v10 = vpop.eup %2238  ;;  %v1532_v35 = vsub.f32 %v3113_v41, %v1498_v7 }
 0x5d7   : > { %v2241_v12 = vpop.eup %2240  ;;  %1548 = vst [vmem:[%s3178_s18] sm:$0xff] %v1529_v9  ;;  %v1494_v13 = vmul.f32 0.6931472, %v2239_v10  ;;  %v1476_v15 = vpop.xlane.xlu0 %1475 }
 0x5d8   : > { %1551 = vst [vmem:[%s3178_s18 + $0x18] sm:$0xff] %v1532_v35  ;;  %v1504_v16 = vmul.f32 0.6931472, %v2241_v12  ;;  %2250 = vlog2.f32 %v1476_v15  ;;  %v1470_v17 = vpop.xlane.xlu1 %1469 }
 0x5d9   : > { %v1530_v18 = vsub.f32 %v3115_v32, %v1494_v13  ;;  %2252 = vlog2.f32 %v1470_v17 }
 0x5da   : > { %v2243_v19 = vpop.eup %2242  ;;  %v1535_v37 = vsub.f32 %v3119_v47, %v1504_v16 }
 0x5db   : > { %v2245_v21 = vpop.eup %2244  ;;  %1549 = vst [vmem:[%s3178_s18 + $0x8] sm:$0xff] %v1530_v18  ;;  %v1506_v41 = vmul.f32 0.6931472, %v2243_v19  ;;  %v1472_v22 = vpop.xlane.xlu0 %1471 }
 0x5dc   : > { %1554 = vst [vmem:[%s3178_s18 + $0x30] sm:$0xff] %v1535_v37  ;;  %v1500_v26 = vmul.f32 0.6931472, %v2245_v21  ;;  %2254 = vlog2.f32 %v1472_v22  ;;  %v1482_v27 = vpop.xlane.xlu1 %1481 }
 0x5dd   : > { %v1536_v29 = vsub.f32 %v3121_v49, %v1506_v41  ;;  %2256 = vlog2.f32 %v1482_v27 }
 0x5de   : > { %v2247_v24 = vpop.eup %2246  ;;  %v1533_v32 = vsub.f32 %v3125_v54, %v1500_v26 }
 0x5df   : > { %v2249_v34 = vpop.eup %2248  ;;  %1555 = vst [vmem:[%s3178_s18 + $0x38] sm:$0xff] %v1536_v29  ;;  %v1502_v47 = vmul.f32 0.6931472, %v2247_v24  ;;  %v1484_v36 = vpop.xlane.xlu0 %1483 }
 0x5e0   : > { %1552 = vst [vmem:[%s3178_s18 + $0x20] sm:$0xff] %v1533_v32  ;;  %v1512_v38 = vmul.f32 0.6931472, %v2249_v34  ;;  %2258 = vlog2.f32 %v1484_v36  ;;  %v1478_v39 = vpop.xlane.xlu1 %1477 }
 0x5e1   : > { %v1534_v40 = vsub.f32 %v3128_v45, %v1502_v47  ;;  %2260 = vlog2.f32 %v1478_v39 }
 0x5e2   : > { %v2251_v28 = vpop.eup %2250  ;;  %v1539_v49 = vsub.f32 %v3133_v61, %v1512_v38 }
 0x5e3   : > { %v2253_v43 = vpop.eup %2252  ;;  %1553 = vst [vmem:[%s3178_s18 + $0x28] sm:$0xff] %v1534_v40  ;;  %v1514_v54 = vmul.f32 0.6931472, %v2251_v28  ;;  %v1480_v44 = vpop.xlane.xlu0 %1479 }
 0x5e4   : > { %1558 = vst [vmem:[%s3178_s18 + $0x50] sm:$0xff] %v1539_v49  ;;  %v1508_v31 = vmul.f32 0.6931472, %v2253_v43  ;;  %2262 = vlog2.f32 %v1480_v44  ;;  %v1486_v46 = vpop.xlane.xlu1 %1485 }
 0x5e5   : > { %v1540_v48 = vsub.f32 %v3136_v0, %v1514_v54  ;;  %2264 = vlog2.f32 %v1486_v46 }
 0x5e6   : > { %v2255_v50 = vpop.eup %2254  ;;  %v1537_v45 = vsub.f32 %v3141_v3, %v1508_v31 }
 0x5e7   : > { %v2257_v51 = vpop.eup %2256  ;;  %1559 = vst [vmem:[%s3178_s18 + $0x58] sm:$0xff] %v1540_v48  ;;  %v1510_v61 = vmul.f32 0.6931472, %v2255_v50  ;;  %v1488_v33 = vpop.xlane.xlu0 %1487 }
 0x5e8   : > { %1556 = vst [vmem:[%s3178_s18 + $0x40] sm:$0xff] %v1537_v45  ;;  %v1520_v52 = vmul.f32 0.6931472, %v2257_v51  ;;  %2266 = vlog2.f32 %v1488_v33  ;;  %v1490_v55 = vpop.xlane.xlu1 %1489 }
 0x5e9   : > { %v1538_v56 = vsub.f32 %v3144_v6, %v1510_v61  ;;  %2268 = vlog2.f32 %v1490_v55 }
 0x5ea   : > { %v2259_v0 = vpop.eup %2258  ;;  %v1543_v57 = vsub.f32 %v3149_v11, %v1520_v52 }
 0x5eb   : > { %v2261_v58 = vpop.eup %2260  ;;  %1557 = vst [vmem:[%s3178_s18 + $0x48] sm:$0xff] %v1538_v56  ;;  %v1522_v3 = vmul.f32 0.6931472, %v2259_v0 }
 0x5ec   : > { %1562 = vst [vmem:[%s3178_s18 + $0x70] sm:$0xff] %v1543_v57  ;;  %v1516_v59 = vmul.f32 0.6931472, %v2261_v58 }
 0x5ed   : > { %v1544_v60 = vsub.f32 %v3152_v14, %v1522_v3 }
 0x5ee   : > { %v2263_v62 = vpop.eup %2262  ;;  %v1541_v63 = vsub.f32 %v3157_v20, %v1516_v59 }
 0x5ef   : > { %v2265_v1 = vpop.eup %2264  ;;  %1563 = vst [vmem:[%s3178_s18 + $0x78] sm:$0xff] %v1544_v60  ;;  %v1518_v6 = vmul.f32 0.6931472, %v2263_v62 }
 0x5f0   : > { %1560 = vst [vmem:[%s3178_s18 + $0x60] sm:$0xff] %v1541_v63  ;;  %v1524_v2 = vmul.f32 0.6931472, %v2265_v1 }
 0x5f1   : > { %v1542_v11 = vsub.f32 %v3160_v23, %v1518_v6 }
 0x5f2   : > { %v2267_v53 = vpop.eup %2266  ;;  %v1545_v4 = vsub.f32 %v3165_v30, %v1524_v2 }
 0x5f3   : > { %v2269_v14 = vpop.eup %2268  ;;  %1561 = vst [vmem:[%s3178_s18 + $0x68] sm:$0xff] %v1542_v11  ;;  %v1526_v5 = vmul.f32 0.6931472, %v2267_v53 }
 0x5f4   : > { %1564 = vst [vmem:[%s3178_s18 + $0x80] sm:$0xff] %v1545_v4  ;;  %v1528_v20 = vmul.f32 0.6931472, %v2269_v14 }
 0x5f5   : > { %v1546_v7 = vsub.f32 %v3169_v25, %v1526_v5 }
 0x5f6   : > { %v1547_v23 = vsub.f32 %v3173_v42, %v1528_v20 }
 0x5f7   : > { %1565 = vst [vmem:[%s3178_s18 + $0x88] sm:$0xff] %v1546_v7 }
 0x5f8   : > { %1566 = vst [vmem:[%s3178_s18 + $0x90] sm:$0xff] %v1547_v23 }
 0x5f9   : > { %2537 = shalt.err (!%p2534_p10)
}
 0x5fa   : > { %s2538_s1 = scalar_lea.hbm %s3219_s27, 2432  ;;  %s2542_s18 = scalar_lea.hbm %s3308_s21, 4864 }
 0x5fb   : > { %p2539_p11 = scmp.ne.s32.totalorder %s3219_s27, %s2538_s1  ;;  %p2543_p7 = scmp.lt.u32.totalorder %s3219_s27, %s3308_s21 }
 0x5fc   : > { %p2544_p5 = scmp.lt.u32.totalorder %s2542_s18, %s2538_s1  ;;  %p2546_p12 = scmp.lt.u32.totalorder %s2538_s1, %s3219_s27 }
 0x5fd   : > { %p2540_p3 = pnand %p2539_p11, %p3309_p1 }
 0x5fe   : > { %p2545_p9 = por %p2544_p5, %p2543_p7 }
 0x5ff   : > { %p2541_p6 = pneg %p2540_p3 }
 0x600   : > { %p2547_p13 = por %p2546_p12, %p2545_p9 }
 0x602   : > { %p2548_p0 = pnand %p2547_p13, %p2541_p6 }
 0x604   : > { %2551 = shalt.err (!%p2548_p0)
}
 0x605   : > { %s2620_s29 = smov 128   ;;  %s2621_s2 = smov 8  }
 0x606   : > { %2055 = dma.vmem_to_hbm [thread:$0]  (%p3309_p1), %s3221_s9, 2432, %s3219_s27, %s1568_s15, %s2620_s29, %s2620_s29, %s2621_s2  }
 0x607 PF: > { %s1596_s17 = sand.u32 1, %s2594_s30   ;;  %p3310_p2 = scmp.ne.s32.totalorder %s3295_s23, 0 }
 0x608   : > { %p3311_p8 = scmp.ge.s32.totalorder %s2606_s12, 2  ;;  %s1597_s20 = scalar_lea.sflag [#allocation4], %s1596_s17 }
 0x60a   : > { %p2087_p4 = pnand %p3311_p8, %p3310_p2 }
 0x60c   : > { %2589 = dma.done.wait (!%p2087_p4), %s1597_s20, 2432  }
 0x60d   : > { %2591 = vsyncadd (!%p2087_p4), %s1597_s20, 4294964864  ;;  %p26_p10 = scmp.ge.s32.totalorder %s2896_s19, 4   ;;  %s3312_s30 = smov %s2598_s10 }
 0x60e   : > { %s3313_s10 = smov %s2602_s11  ;;  %s3314_s11 = smov %s2907_s13 }
 0x60f   : > { %s3315_s12 = smov %s2896_s19  ;;  %28 = sbr.rel (!%p26_p10) target bundleno = 13 (0xd), region = 133 }
 0x616   :  { %1602 = vsyncpa [#allocation3], 1 }
 0x617   :  { %1604 = vsyncpa [#allocation3 + $0x1], 1 }
 0x618   :  { %1605 = vsyncpa [#allocation6], 1 }
 0x619   :  { %1606 = vsyncpa [#allocation9], 1 }
 0x61a   :  { %1607 = vsyncpa [#allocation12], 1 }
 0x61b   :  { %1608 = vsyncpa [#allocation15], 1 }
 0x61c   :  { %1609 = vsyncpa [#allocation4], 1 }
 0x61d   :  { %1611 = vsyncpa [#allocation4 + $0x1], 1 }

</bundles_post_ra>
